<compile_context>
chip_gen: v7x
topology: tpu7x:2x2x1
jax: 0.10.0
libtpu: 0.0.40
codegen_flags: <defaults>
</compile_context>

<pallas_src>
import jax
import jax.numpy as jnp
from jax.experimental import pallas as pl
from jax.experimental.pallas import tpu as pltpu

IN_DIM = 32 * 32 * 3
DIMS = [(IN_DIM, 256), (256, 256), (256, 256), (256, 256), (256, 64), (64, 8)]
OUT_DIM = DIMS[-1][1]


def _round_up(x, m):
    return ((x + m - 1) // m) * m


def _cdiv(a, b):
    return (a + b - 1) // b


def mlp_kernel(x_ref,
               w1_ref, b1_ref,
               w2_ref, b2_ref,
               w3_ref, b3_ref,
               w4_ref, b4_ref,
               w5_ref, b5_ref,
               w6_ref, b6_ref,
               o_ref):
    # Cast the f32 input tile to bf16 inside the kernel so HBM only ever sees
    # the original f32 x once (no wrapper-side casted/padded copy).
    h = x_ref[...].astype(jnp.bfloat16)          # (TB, 3072) bf16

    def linear_relu(h, w_ref, b_ref):
        # bf16 x bf16 -> f32 accumulate on the MXU; bias + ReLU in f32 (VPU),
        # then back to bf16 for the next layer's MXU feed.
        y = jnp.dot(h, w_ref[...], preferred_element_type=jnp.float32) + b_ref[...]
        return jnp.maximum(y, 0.0).astype(jnp.bfloat16)

    h = linear_relu(h, w1_ref, b1_ref)   # (TB, 256)
    h = linear_relu(h, w2_ref, b2_ref)   # (TB, 256)
    h = linear_relu(h, w3_ref, b3_ref)   # (TB, 256)
    h = linear_relu(h, w4_ref, b4_ref)   # (TB, 256)
    h = linear_relu(h, w5_ref, b5_ref)   # (TB, 64)
    # Final layer: no ReLU, f32 output. The (TB, 8) store is a masked vst but
    # is negligible vs the ~3-4k MXU cycles per grid step — intentionally kept.
    o_ref[...] = (jnp.dot(h, w6_ref[...], preferred_element_type=jnp.float32)
                  + b6_ref[...])


def _vmem_capacity_bytes():
    """Per-core VMEM capacity; conservative (v7x-sized) fallback."""
    try:
        return int(pltpu.get_tpu_info().vmem_capacity_bytes)
    except Exception:
        return 64 << 20


def _choose_tb(batch, cap, min_steps):
    """Largest multiple-of-8 tile <= cap that minimizes padded rows while
    keeping at least `min_steps` grid steps."""
    steps = max(_cdiv(batch, cap), min_steps)
    return max(8, _round_up(_cdiv(batch, steps), 8))


def mlp_forward(x_nchw, params, *, tb=None):
    B = x_nchw.shape[0]
    # Row-major flatten, identical to torch's x.reshape(-1, 32*32*3) on NCHW.
    # Keep the incoming dtype (f32): the bf16 cast happens inside the kernel.
    x2d = x_nchw.reshape(B, IN_DIM)
    x_itemsize = jnp.dtype(x2d.dtype).itemsize

    vmem_cap = _vmem_capacity_bytes()
    small_vmem = vmem_cap < (96 << 20)                 # v7x-like: 64 MiB / TC
    tb_cap = tb if tb is not None else (1024 if small_vmem else 2048)
    # v7x has 2 TensorCores: keep >=2 grid steps so "parallel" can shard them.
    min_steps = 2 if (small_vmem and B >= 16) else 1

    TB = _choose_tb(B, tb_cap, min_steps)
    grid_steps = _cdiv(B, TB)

    flat_params = []
    for (w, b) in params:
        flat_params.append(w.astype(jnp.bfloat16))                 # (in, out) bf16
        flat_params.append(b.astype(jnp.float32).reshape(1, -1))   # (1, out) f32

    in_specs = [pl.BlockSpec((TB, IN_DIM), lambda i: (i, 0))]
    for (fan_in, fan_out) in DIMS:
        # Grid-invariant weights/biases: constant index_map keeps them resident
        # in VMEM across all grid steps; Buffered(1) drops the pointless second
        # pipeline buffer (saves ~weight-set-sized VMEM, helps v7x headroom).
        in_specs.append(pl.BlockSpec((fan_in, fan_out), lambda i: (0, 0),
                                     pipeline_mode=pl.Buffered(buffer_count=1)))
        in_specs.append(pl.BlockSpec((1, fan_out), lambda i: (0, 0),
                                     pipeline_mode=pl.Buffered(buffer_count=1)))

    out_specs = pl.BlockSpec((TB, OUT_DIM), lambda i: (i, 0))

    # VMEM budget: double-buffered f32 x tile + single-buffered weights +
    # double-buffered tiny output tile + intermediate activations + headroom.
    weight_bytes = sum(fi * fo * 2 + fo * 4 for (fi, fo) in DIMS)
    vmem_limit = (2 * TB * IN_DIM * x_itemsize
                  + weight_bytes
                  + 2 * TB * OUT_DIM * 4
                  + 4 * TB * 256 * 4
                  + (8 << 20))
    vmem_limit = max(32 << 20, vmem_limit)
    vmem_limit = min(vmem_limit, (48 << 20) if small_vmem else (100 << 20))

    computed_rows = grid_steps * TB
    flops = 2 * computed_rows * sum(fi * fo for (fi, fo) in DIMS)
    bytes_accessed = (B * IN_DIM * x_itemsize      # f32 x read once
                      + weight_bytes               # weights/biases read once
                      + B * OUT_DIM * 4)           # f32 output write

    out = pl.pallas_call(
        mlp_kernel,
        out_shape=jax.ShapeDtypeStruct((B, OUT_DIM), jnp.float32),
        grid=(grid_steps,),
        in_specs=in_specs,
        out_specs=out_specs,
        compiler_params=pltpu.CompilerParams(
            dimension_semantics=("parallel",),     # megacore-shardable on v7x
            vmem_limit_bytes=int(vmem_limit),
        ),
        cost_estimate=pl.CostEstimate(
            flops=int(flops), transcendentals=0,
            bytes_accessed=int(bytes_accessed)),
    )(x2d, *flat_params)

    return out


def init_params(key):
    """Deterministic init mimicking PyTorch nn.Linear default
    (U[-1/sqrt(in), 1/sqrt(in)]). Weights stored as (in, out); bias (1, out)."""
    params = []
    for (fan_in, fan_out) in DIMS:
        key, kw, kb = jax.random.split(key, 3)
        bound = 1.0 / (fan_in ** 0.5)
        w = jax.random.uniform(kw, (fan_in, fan_out), jnp.float32, -bound, bound)
        b = jax.random.uniform(kb, (1, fan_out), jnp.float32, -bound, bound)
        params.append((w, b))
    return params


def mlp_reference(x_nchw, params):
    """Pure-JAX reference with the same bf16-weights / f32-accumulate recipe."""
    B = x_nchw.shape[0]
    h = x_nchw.reshape(B, IN_DIM).astype(jnp.bfloat16)
    for i, (w, b) in enumerate(params):
        y = jnp.dot(h, w.astype(jnp.bfloat16),
                    preferred_element_type=jnp.float32) + b.astype(jnp.float32).reshape(1, -1)
        if i < len(params) - 1:
            h = jnp.maximum(y, 0.0).astype(jnp.bfloat16)
        else:
            h = y
    return h


if __name__ == "__main__":
    key = jax.random.PRNGKey(0)
    key, kx = jax.random.split(key)

    # Small NCHW input consistent with the module's 32*32*3 flatten.
    B = 2
    x = jax.random.normal(kx, (B, 3, 32, 32), jnp.float32)

    params = init_params(key)

    out = mlp_forward(x, params)
    out = jax.block_until_ready(out)

    ref = mlp_reference(x, params)
    assert out.shape == (B, OUT_DIM), out.shape
    assert jnp.allclose(out, ref, atol=2e-2, rtol=2e-2), "mismatch vs JAX reference"

    print("KERNEL_OK")
</pallas_src>

<mosaic_0001>
module attributes {stable_mosaic.version = 11 : i64} {
  func.func @mlp_kernel(%arg0: i32, %arg1: memref<8x3072xf32, #tpu.memory_space<vmem>>, %arg2: memref<3072x256xbf16, #tpu.memory_space<vmem>>, %arg3: memref<1x256xf32, #tpu.memory_space<vmem>>, %arg4: memref<256x256xbf16, #tpu.memory_space<vmem>>, %arg5: memref<1x256xf32, #tpu.memory_space<vmem>>, %arg6: memref<256x256xbf16, #tpu.memory_space<vmem>>, %arg7: memref<1x256xf32, #tpu.memory_space<vmem>>, %arg8: memref<256x256xbf16, #tpu.memory_space<vmem>>, %arg9: memref<1x256xf32, #tpu.memory_space<vmem>>, %arg10: memref<256x64xbf16, #tpu.memory_space<vmem>>, %arg11: memref<1x64xf32, #tpu.memory_space<vmem>>, %arg12: memref<64x8xbf16, #tpu.memory_space<vmem>>, %arg13: memref<1x8xf32, #tpu.memory_space<vmem>>, %arg14: memref<8x8xf32, #tpu.memory_space<vmem>>) attributes {dimension_semantics = [#tpu.dimension_semantics<parallel>], iteration_bounds = array<i64: 1>, scalar_prefetch = 0 : i64, scratch_operands = 0 : i64, tpu.core_type = #tpu.core_type<tc>, window_params = [{transform_indices = @transform_0, window_bounds = array<i64: 8, 3072>}, {pipeline_mode = #tpu.pipeline_mode<synchronous>, transform_indices = @transform_1, window_bounds = array<i64: 3072, 256>}, {pipeline_mode = #tpu.pipeline_mode<synchronous>, transform_indices = @transform_2, window_bounds = array<i64: 1, 256>}, {pipeline_mode = #tpu.pipeline_mode<synchronous>, transform_indices = @transform_3, window_bounds = array<i64: 256, 256>}, {pipeline_mode = #tpu.pipeline_mode<synchronous>, transform_indices = @transform_4, window_bounds = array<i64: 1, 256>}, {pipeline_mode = #tpu.pipeline_mode<synchronous>, transform_indices = @transform_5, window_bounds = array<i64: 256, 256>}, {pipeline_mode = #tpu.pipeline_mode<synchronous>, transform_indices = @transform_6, window_bounds = array<i64: 1, 256>}, {pipeline_mode = #tpu.pipeline_mode<synchronous>, transform_indices = @transform_7, window_bounds = array<i64: 256, 256>}, {pipeline_mode = #tpu.pipeline_mode<synchronous>, transform_indices = @transform_8, window_bounds = array<i64: 1, 256>}, {pipeline_mode = #tpu.pipeline_mode<synchronous>, transform_indices = @transform_9, window_bounds = array<i64: 256, 64>}, {pipeline_mode = #tpu.pipeline_mode<synchronous>, transform_indices = @transform_10, window_bounds = array<i64: 1, 64>}, {pipeline_mode = #tpu.pipeline_mode<synchronous>, transform_indices = @transform_11, window_bounds = array<i64: 64, 8>}, {pipeline_mode = #tpu.pipeline_mode<synchronous>, transform_indices = @transform_12, window_bounds = array<i64: 1, 8>}, {transform_indices = @transform_13, window_bounds = array<i64: 8, 8>}]} {
    %c0 = arith.constant 0 : index
    %c0_0 = arith.constant 0 : index
    %0 = vector.load %arg1[%c0, %c0_0] : memref<8x3072xf32, #tpu.memory_space<vmem>>, vector<8x3072xf32>
    %1 = arith.truncf %0 : vector<8x3072xf32> to vector<8x3072xbf16>
    %c0_1 = arith.constant 0 : index
    %c0_2 = arith.constant 0 : index
    %2 = vector.load %arg2[%c0_1, %c0_2] : memref<3072x256xbf16, #tpu.memory_space<vmem>>, vector<3072x256xbf16>
    %cst = arith.constant dense<0.000000e+00> : vector<8x256xf32>
    %3 = tpu.matmul %1, %2, %cst {dimension_numbers = #tpu.dot_dimension_numbers<[1], [0], [0], [1], [0, 0, 1, 1], [], []>} : vector<8x3072xbf16>, vector<3072x256xbf16>, vector<8x256xf32> -> vector<8x256xf32>
    %c0_3 = arith.constant 0 : index
    %c0_4 = arith.constant 0 : index
    %4 = vector.load %arg3[%c0_3, %c0_4] : memref<1x256xf32, #tpu.memory_space<vmem>>, vector<1x256xf32>
    %5 = vector.broadcast %4 : vector<1x256xf32> to vector<8x256xf32>
    %6 = arith.addf %3, %5 : vector<8x256xf32>
    %cst_5 = arith.constant 0.000000e+00 : f32
    %7 = vector.broadcast %cst_5 : f32 to vector<8x256xf32>
    %8 = arith.maximumf %6, %7 : vector<8x256xf32>
    %9 = arith.truncf %8 : vector<8x256xf32> to vector<8x256xbf16>
    %c0_6 = arith.constant 0 : index
    %c0_7 = arith.constant 0 : index
    %10 = vector.load %arg4[%c0_6, %c0_7] : memref<256x256xbf16, #tpu.memory_space<vmem>>, vector<256x256xbf16>
    %cst_8 = arith.constant dense<0.000000e+00> : vector<8x256xf32>
    %11 = tpu.matmul %9, %10, %cst_8 {dimension_numbers = #tpu.dot_dimension_numbers<[1], [0], [0], [1], [0, 0, 1, 1], [], []>} : vector<8x256xbf16>, vector<256x256xbf16>, vector<8x256xf32> -> vector<8x256xf32>
    %c0_9 = arith.constant 0 : index
    %c0_10 = arith.constant 0 : index
    %12 = vector.load %arg5[%c0_9, %c0_10] : memref<1x256xf32, #tpu.memory_space<vmem>>, vector<1x256xf32>
    %13 = vector.broadcast %12 : vector<1x256xf32> to vector<8x256xf32>
    %14 = arith.addf %11, %13 : vector<8x256xf32>
    %cst_11 = arith.constant 0.000000e+00 : f32
    %15 = vector.broadcast %cst_11 : f32 to vector<8x256xf32>
    %16 = arith.maximumf %14, %15 : vector<8x256xf32>
    %17 = arith.truncf %16 : vector<8x256xf32> to vector<8x256xbf16>
    %c0_12 = arith.constant 0 : index
    %c0_13 = arith.constant 0 : index
    %18 = vector.load %arg6[%c0_12, %c0_13] : memref<256x256xbf16, #tpu.memory_space<vmem>>, vector<256x256xbf16>
    %cst_14 = arith.constant dense<0.000000e+00> : vector<8x256xf32>
    %19 = tpu.matmul %17, %18, %cst_14 {dimension_numbers = #tpu.dot_dimension_numbers<[1], [0], [0], [1], [0, 0, 1, 1], [], []>} : vector<8x256xbf16>, vector<256x256xbf16>, vector<8x256xf32> -> vector<8x256xf32>
    %c0_15 = arith.constant 0 : index
    %c0_16 = arith.constant 0 : index
    %20 = vector.load %arg7[%c0_15, %c0_16] : memref<1x256xf32, #tpu.memory_space<vmem>>, vector<1x256xf32>
    %21 = vector.broadcast %20 : vector<1x256xf32> to vector<8x256xf32>
    %22 = arith.addf %19, %21 : vector<8x256xf32>
    %cst_17 = arith.constant 0.000000e+00 : f32
    %23 = vector.broadcast %cst_17 : f32 to vector<8x256xf32>
    %24 = arith.maximumf %22, %23 : vector<8x256xf32>
    %25 = arith.truncf %24 : vector<8x256xf32> to vector<8x256xbf16>
    %c0_18 = arith.constant 0 : index
    %c0_19 = arith.constant 0 : index
    %26 = vector.load %arg8[%c0_18, %c0_19] : memref<256x256xbf16, #tpu.memory_space<vmem>>, vector<256x256xbf16>
    %cst_20 = arith.constant dense<0.000000e+00> : vector<8x256xf32>
    %27 = tpu.matmul %25, %26, %cst_20 {dimension_numbers = #tpu.dot_dimension_numbers<[1], [0], [0], [1], [0, 0, 1, 1], [], []>} : vector<8x256xbf16>, vector<256x256xbf16>, vector<8x256xf32> -> vector<8x256xf32>
    %c0_21 = arith.constant 0 : index
    %c0_22 = arith.constant 0 : index
    %28 = vector.load %arg9[%c0_21, %c0_22] : memref<1x256xf32, #tpu.memory_space<vmem>>, vector<1x256xf32>
    %29 = vector.broadcast %28 : vector<1x256xf32> to vector<8x256xf32>
    %30 = arith.addf %27, %29 : vector<8x256xf32>
    %cst_23 = arith.constant 0.000000e+00 : f32
    %31 = vector.broadcast %cst_23 : f32 to vector<8x256xf32>
    %32 = arith.maximumf %30, %31 : vector<8x256xf32>
    %33 = arith.truncf %32 : vector<8x256xf32> to vector<8x256xbf16>
    %c0_24 = arith.constant 0 : index
    %c0_25 = arith.constant 0 : index
    %34 = vector.load %arg10[%c0_24, %c0_25] : memref<256x64xbf16, #tpu.memory_space<vmem>>, vector<256x64xbf16>
    %cst_26 = arith.constant dense<0.000000e+00> : vector<8x64xf32>
    %35 = tpu.matmul %33, %34, %cst_26 {dimension_numbers = #tpu.dot_dimension_numbers<[1], [0], [0], [1], [0, 0, 1, 1], [], []>} : vector<8x256xbf16>, vector<256x64xbf16>, vector<8x64xf32> -> vector<8x64xf32>
    %c0_27 = arith.constant 0 : index
    %c0_28 = arith.constant 0 : index
    %36 = vector.load %arg11[%c0_27, %c0_28] : memref<1x64xf32, #tpu.memory_space<vmem>>, vector<1x64xf32>
    %37 = vector.broadcast %36 : vector<1x64xf32> to vector<8x64xf32>
    %38 = arith.addf %35, %37 : vector<8x64xf32>
    %cst_29 = arith.constant 0.000000e+00 : f32
    %39 = vector.broadcast %cst_29 : f32 to vector<8x64xf32>
    %40 = arith.maximumf %38, %39 : vector<8x64xf32>
    %41 = arith.truncf %40 : vector<8x64xf32> to vector<8x64xbf16>
    %c0_30 = arith.constant 0 : index
    %c0_31 = arith.constant 0 : index
    %42 = vector.load %arg12[%c0_30, %c0_31] : memref<64x8xbf16, #tpu.memory_space<vmem>>, vector<64x8xbf16>
    %cst_32 = arith.constant dense<0.000000e+00> : vector<8x8xf32>
    %43 = tpu.matmul %41, %42, %cst_32 {dimension_numbers = #tpu.dot_dimension_numbers<[1], [0], [0], [1], [0, 0, 1, 1], [], []>} : vector<8x64xbf16>, vector<64x8xbf16>, vector<8x8xf32> -> vector<8x8xf32>
    %c0_33 = arith.constant 0 : index
    %c0_34 = arith.constant 0 : index
    %44 = vector.load %arg13[%c0_33, %c0_34] : memref<1x8xf32, #tpu.memory_space<vmem>>, vector<1x8xf32>
    %45 = vector.broadcast %44 : vector<1x8xf32> to vector<8x8xf32>
    %46 = arith.addf %43, %45 : vector<8x8xf32>
    %c0_35 = arith.constant 0 : index
    %c0_36 = arith.constant 0 : index
    %47 = vector.load %arg14[%c0_35, %c0_36] : memref<8x8xf32, #tpu.memory_space<vmem>>, vector<8x8xf32>
    tpu.vector_store %arg14[%c0_35, %c0_36], %46 {strides = array<i32>} : memref<8x8xf32, #tpu.memory_space<vmem>>, vector<8x8xf32>,
    return
  }
  func.func @transform_0(%arg0: i32) -> (i32, i32) {
    %c0_i32 = arith.constant 0 : i32
    %c0_i32_0 = arith.constant 0 : i32
    return %arg0, %c0_i32 : i32, i32
  }
  func.func @transform_1(%arg0: i32) -> (i32, i32) {
    %c0_i32 = arith.constant 0 : i32
    %c0_i32_0 = arith.constant 0 : i32
    %c0_i32_1 = arith.constant 0 : i32
    return %c0_i32, %c0_i32_0 : i32, i32
  }
  func.func @transform_2(%arg0: i32) -> (i32, i32) {
    %c0_i32 = arith.constant 0 : i32
    %c0_i32_0 = arith.constant 0 : i32
    %c0_i32_1 = arith.constant 0 : i32
    return %c0_i32, %c0_i32_0 : i32, i32
  }
  func.func @transform_3(%arg0: i32) -> (i32, i32) {
    %c0_i32 = arith.constant 0 : i32
    %c0_i32_0 = arith.constant 0 : i32
    %c0_i32_1 = arith.constant 0 : i32
    return %c0_i32, %c0_i32_0 : i32, i32
  }
  func.func @transform_4(%arg0: i32) -> (i32, i32) {
    %c0_i32 = arith.constant 0 : i32
    %c0_i32_0 = arith.constant 0 : i32
    %c0_i32_1 = arith.constant 0 : i32
    return %c0_i32, %c0_i32_0 : i32, i32
  }
  func.func @transform_5(%arg0: i32) -> (i32, i32) {
    %c0_i32 = arith.constant 0 : i32
    %c0_i32_0 = arith.constant 0 : i32
    %c0_i32_1 = arith.constant 0 : i32
    return %c0_i32, %c0_i32_0 : i32, i32
  }
  func.func @transform_6(%arg0: i32) -> (i32, i32) {
    %c0_i32 = arith.constant 0 : i32
    %c0_i32_0 = arith.constant 0 : i32
    %c0_i32_1 = arith.constant 0 : i32
    return %c0_i32, %c0_i32_0 : i32, i32
  }
  func.func @transform_7(%arg0: i32) -> (i32, i32) {
    %c0_i32 = arith.constant 0 : i32
    %c0_i32_0 = arith.constant 0 : i32
    %c0_i32_1 = arith.constant 0 : i32
    return %c0_i32, %c0_i32_0 : i32, i32
  }
  func.func @transform_8(%arg0: i32) -> (i32, i32) {
    %c0_i32 = arith.constant 0 : i32
    %c0_i32_0 = arith.constant 0 : i32
    %c0_i32_1 = arith.constant 0 : i32
    return %c0_i32, %c0_i32_0 : i32, i32
  }
  func.func @transform_9(%arg0: i32) -> (i32, i32) {
    %c0_i32 = arith.constant 0 : i32
    %c0_i32_0 = arith.constant 0 : i32
    %c0_i32_1 = arith.constant 0 : i32
    return %c0_i32, %c0_i32_0 : i32, i32
  }
  func.func @transform_10(%arg0: i32) -> (i32, i32) {
    %c0_i32 = arith.constant 0 : i32
    %c0_i32_0 = arith.constant 0 : i32
    %c0_i32_1 = arith.constant 0 : i32
    return %c0_i32, %c0_i32_0 : i32, i32
  }
  func.func @transform_11(%arg0: i32) -> (i32, i32) {
    %c0_i32 = arith.constant 0 : i32
    %c0_i32_0 = arith.constant 0 : i32
    %c0_i32_1 = arith.constant 0 : i32
    return %c0_i32, %c0_i32_0 : i32, i32
  }
  func.func @transform_12(%arg0: i32) -> (i32, i32) {
    %c0_i32 = arith.constant 0 : i32
    %c0_i32_0 = arith.constant 0 : i32
    %c0_i32_1 = arith.constant 0 : i32
    return %c0_i32, %c0_i32_0 : i32, i32
  }
  func.func @transform_13(%arg0: i32) -> (i32, i32) {
    %c0_i32 = arith.constant 0 : i32
    %c0_i32_0 = arith.constant 0 : i32
    return %arg0, %c0_i32 : i32, i32
  }
}

</mosaic_0001>

<bundles_post_ra>
// kernel: tpu_custom_call.1
= control target key start
LH: loop header
LB: loop body
LE: loop exit
PB: predicated region body
PF: predicated region fallthrough
CT: control target
= control target key end

     0   :  { %18 = vsyncpa [#allocation3], 0  ;;  %s6441_s0 = inlined_call_operand.hbm [shape: f32[2,3072], index: 0, kind: input, shape index: {}]   ;;  %s6442_s1 = inlined_call_operand.hbm [shape: bf16[3072,256], index: 1, kind: input, shape index: {}]   ;;  %s6443_s2 = inlined_call_operand.hbm [shape: f32[1,256], index: 2, kind: input, shape index: {}]   ;;  %s6444_s3 = inlined_call_operand.hbm [shape: bf16[256,256], index: 3, kind: input, shape index: {}]   ;;  %s6445_s4 = inlined_call_operand.hbm [shape: f32[1,256], index: 4, kind: input, shape index: {}]   ;;  %s6446_s5 = inlined_call_operand.hbm [shape: bf16[256,256], index: 5, kind: input, shape index: {}]   ;;  %s6447_s6 = inlined_call_operand.hbm [shape: f32[1,256], index: 6, kind: input, shape index: {}]   ;;  %s6448_s7 = inlined_call_operand.hbm [shape: bf16[256,256], index: 7, kind: input, shape index: {}]   ;;  %s6449_s8 = inlined_call_operand.hbm [shape: f32[1,256], index: 8, kind: input, shape index: {}]   ;;  %s6450_s9 = inlined_call_operand.vmem [shape: bf16[256,64], index: 9, kind: input, shape index: {}]   ;;  %s6451_s10 = inlined_call_operand.hbm [shape: f32[1,64], index: 10, kind: input, shape index: {}]   ;;  %s6452_s11 = inlined_call_operand.vmem [shape: bf16[64,8], index: 11, kind: input, shape index: {}]   ;;  %s6453_s12 = inlined_call_operand.hbm [shape: f32[1,8], index: 12, kind: input, shape index: {}]   ;;  %s6454_s13 = inlined_call_operand.hbm [shape: f32[2,8], index: 13, kind: output, shape index: {}]  }
   0x1   :  { %19 = vsyncpa [#allocation6], 0 }
   0x2   :  { %20 = vsyncpa [#allocation9], 0 }
   0x3   :  { %21 = vsyncpa [#allocation12], 0 }
   0x4   :  { %22 = vsyncpa [#allocation15], 0 }
   0x5   :  { %23 = vsyncpa [#allocation18], 0 }
   0x6   :  { %24 = vsyncpa [#allocation4], 0 }
   0x7   :  { %29 = vsyncadd [#allocation3], 2304  ;;  %s5999_s25 = smov [#allocation5]   ;;  %s5721_s29 = scalar_lea.hbm %s6442_s1, 49152 }
   0x8   :  { %s42_s26 = sshll.u32 %s5999_s25, 4  ;;  %p5722_p0 = scmp.ne.s32.totalorder %s6442_s1, %s5721_s29  ;;  %s43_s26 = int_to_ptr.vmem [resolvable:$true] %s42_s26 }
   0x9   :  { %p5725_p1 = scmp.lt.u32.totalorder %s5721_s29, %s6442_s1 }
   0xb   :  { %p5727_p2 = pnand %p5725_p1, %p5722_p0 }
   0xd   :  { %5730 = shalt.err (!%p5727_p2)
}
   0xe   :  { %s5731_s17 = scalar_lea.vmem %s43_s26, 49152  ;;  %p5736_p4 = scmp.lt.s32.totalorder %s43_s26, %s43_s26 }
   0xf   :  { %p5732_p3 = scmp.ne.s32.totalorder %s43_s26, %s5731_s17  ;;  %p5737_p5 = scmp.lt.s32.totalorder %s5731_s17, %s5731_s17 }
  0x11   :  { %p5738_p6 = por %p5737_p5, %p5736_p4 }
  0x13   :  { %p5739_p7 = pnand %p5738_p6, %p5732_p3 }
  0x15   :  { %5742 = shalt.err (!%p5739_p7)
}
  0x16   :  { %s6000_s18 = smov 128   ;;  %s6001_s19 = smov 8  }
  0x17   :  { %48 = dma.hbm_to_vmem [thread:$0]  %s6442_s1, 49152, %s43_s26, [#allocation6], %s6000_s18, %s6000_s18, %s6001_s19  }
  0x18   :  { %s6002_s22 = smov [#allocation8]   ;;  %s6003_s24 = smov [#allocation11]  }
  0x19   :  { %s64_s23 = sshll.u32 %s6002_s22, 4  ;;  %s86_s25 = sshll.u32 %s6003_s24, 4  ;;  %s65_s23 = int_to_ptr.vmem [resolvable:$true] %s64_s23  ;;  %s87_s25 = int_to_ptr.vmem [resolvable:$true] %s86_s25 }
  0x1a   :  { %s5743_s29 = scalar_lea.hbm %s6444_s3, 4096 }
  0x1b   :  { %p5744_p8 = scmp.ne.s32.totalorder %s6444_s3, %s5743_s29  ;;  %p5747_p9 = scmp.lt.u32.totalorder %s5743_s29, %s6444_s3 }
  0x1d   :  { %p5749_p10 = pnand %p5747_p9, %p5744_p8 }
  0x1f   :  { %5752 = shalt.err (!%p5749_p10)
}
  0x20   :  { %s5753_s1 = scalar_lea.vmem %s65_s23, 4096  ;;  %p5758_p12 = scmp.lt.s32.totalorder %s65_s23, %s65_s23 }
  0x21   :  { %p5754_p11 = scmp.ne.s32.totalorder %s65_s23, %s5753_s1  ;;  %p5759_p13 = scmp.lt.s32.totalorder %s5753_s1, %s5753_s1 }
  0x23   :  { %p5760_p0 = por %p5759_p13, %p5758_p12 }
  0x25   :  { %p5761_p1 = pnand %p5760_p0, %p5754_p11 }
  0x27   :  { %5764 = shalt.err (!%p5761_p1)
}
  0x28   :  { %70 = dma.hbm_to_vmem [thread:$0]  %s6444_s3, 4096, %s65_s23, [#allocation9], %s6000_s18, %s6000_s18, %s6001_s19  }
  0x29   :  { %s5765_s22 = scalar_lea.hbm %s6446_s5, 4096 }
  0x2a   :  { %p5766_p2 = scmp.ne.s32.totalorder %s6446_s5, %s5765_s22  ;;  %p5769_p3 = scmp.lt.u32.totalorder %s5765_s22, %s6446_s5 }
  0x2c   :  { %p5771_p4 = pnand %p5769_p3, %p5766_p2 }
  0x2e   :  { %5774 = shalt.err (!%p5771_p4)
}
  0x2f   :  { %s5775_s30 = scalar_lea.vmem %s87_s25, 4096  ;;  %p5780_p6 = scmp.lt.s32.totalorder %s87_s25, %s87_s25 }
  0x30   :  { %p5776_p5 = scmp.ne.s32.totalorder %s87_s25, %s5775_s30  ;;  %p5781_p7 = scmp.lt.s32.totalorder %s5775_s30, %s5775_s30 }
  0x32   :  { %p5782_p8 = por %p5781_p7, %p5780_p6 }
  0x34   :  { %p5783_p9 = pnand %p5782_p8, %p5776_p5 }
  0x36   :  { %5786 = shalt.err (!%p5783_p9)
}
  0x37   :  { %92 = dma.hbm_to_vmem [thread:$0]  %s6446_s5, 4096, %s87_s25, [#allocation12], %s6000_s18, %s6000_s18, %s6001_s19  }
  0x38   :  { %s6004_s14 = smov [#allocation14]   ;;  %s6005_s16 = smov [#allocation17]  }
  0x39   :  { %s108_s15 = sshll.u32 %s6004_s14, 4  ;;  %s133_s1 = sshll.u32 %s6005_s16, 4  ;;  %s109_s15 = int_to_ptr.vmem [resolvable:$true] %s108_s15  ;;  %s134_s1 = int_to_ptr.vmem [resolvable:$true] %s133_s1 }
  0x3a   :  { %s5787_s20 = scalar_lea.hbm %s6448_s7, 4096 }
  0x3b   :  { %p5788_p10 = scmp.ne.s32.totalorder %s6448_s7, %s5787_s20  ;;  %p5791_p11 = scmp.lt.u32.totalorder %s5787_s20, %s6448_s7 }
  0x3d   :  { %p5793_p12 = pnand %p5791_p11, %p5788_p10 }
  0x3f   :  { %5796 = shalt.err (!%p5793_p12)
}
  0x40   :  { %s5797_s5 = scalar_lea.vmem %s109_s15, 4096  ;;  %p5802_p0 = scmp.lt.s32.totalorder %s109_s15, %s109_s15 }
  0x41   :  { %p5798_p13 = scmp.ne.s32.totalorder %s109_s15, %s5797_s5  ;;  %p5803_p1 = scmp.lt.s32.totalorder %s5797_s5, %s5797_s5 }
  0x43   :  { %p5804_p2 = por %p5803_p1, %p5802_p0 }
  0x45   :  { %p5805_p3 = pnand %p5804_p2, %p5798_p13 }
  0x47   :  { %5808 = shalt.err (!%p5805_p3)
}
  0x48   :  { %114 = dma.hbm_to_vmem [thread:$0]  %s6448_s7, 4096, %s109_s15, [#allocation15], %s6000_s18, %s6000_s18, %s6001_s19  }
  0x49   :  { %s5809_s3 = scalar_lea.hbm %s6451_s10, 16 }
  0x4a   :  { %p5810_p4 = scmp.ne.s32.totalorder %s6451_s10, %s5809_s3  ;;  %p5813_p5 = scmp.lt.u32.totalorder %s5809_s3, %s6451_s10 }
  0x4c   :  { %p5815_p6 = pnand %p5813_p5, %p5810_p4 }
  0x4e   :  { %5818 = shalt.err (!%p5815_p6)
}
  0x4f   :  { %s5819_s17 = scalar_lea.vmem %s134_s1, 16  ;;  %s5823_s20 = scalar_lea.vmem %s134_s1, 32 }
  0x50   :  { %p5820_p7 = scmp.ne.s32.totalorder %s134_s1, %s5819_s17  ;;  %p5824_p8 = scmp.lt.s32.totalorder %s134_s1, %s134_s1 }
  0x51   :  { %p5825_p9 = scmp.lt.s32.totalorder %s5823_s20, %s5819_s17 }
  0x53   :  { %p5826_p10 = por %p5825_p9, %p5824_p8 }
  0x55   :  { %p5827_p11 = pnand %p5826_p10, %p5820_p7 }
  0x57   :  { %5830 = shalt.err (!%p5827_p11)
}
  0x58   :  { %136 = dma.hbm_to_vmem [thread:$0]  %s6451_s10, 16, %s134_s1, [#allocation18]  }
  0x59   :  { %s6006_s19 = smov [#allocation2]   ;;  %s5831_s24 = scalar_lea.hbm %s6441_s0, 768 }
  0x5a   :  { %s30_s15 = sshll.u32 %s6006_s19, 4  ;;  %p5832_p12 = scmp.ne.s32.totalorder %s6441_s0, %s5831_s24  ;;  %s31_s15 = int_to_ptr.vmem [resolvable:$true] %s30_s15 }
  0x5b   :  { %p5835_p13 = scmp.lt.u32.totalorder %s5831_s24, %s6441_s0 }
  0x5d   :  { %p5837_p0 = pnand %p5835_p13, %p5832_p12 }
  0x5f   :  { %5840 = shalt.err (!%p5837_p0)
}
  0x60   :  { %s5841_s29 = scalar_lea.vmem %s31_s15, 768  ;;  %s5845_s10 = scalar_lea.vmem %s31_s15, 3072 }
  0x61   :  { %p5842_p1 = scmp.ne.s32.totalorder %s31_s15, %s5841_s29  ;;  %p5846_p2 = scmp.lt.s32.totalorder %s31_s15, %s31_s15 }
  0x62   :  { %p5847_p3 = scmp.lt.s32.totalorder %s5845_s10, %s5841_s29 }
  0x64   :  { %p5848_p4 = por %p5847_p3, %p5846_p2 }
  0x66   :  { %p5849_p5 = pnand %p5848_p4, %p5842_p1 }
  0x68   :  { %5852 = shalt.err (!%p5849_p5)
}
  0x69   :  { %s6007_s1 = smov 768   ;;  %s6008_s30 = smov 48  }
  0x6a   :  { %36 = dma.hbm_to_vmem [thread:$0]  %s6441_s0, 768, %s31_s15, [#allocation3], %s6007_s1, %s6007_s1, %s6008_s30  }
  0x6b   :  { %s6009_s14 = smov [#allocation7]   ;;  %s6010_s26 = smov [#allocation10]  }
  0x6c   :  { %s55_s16 = sshll.u32 %s6009_s14, 4  ;;  %s77_s17 = sshll.u32 %s6010_s26, 4  ;;  %s56_s16 = int_to_ptr.vmem [resolvable:$true] %s55_s16  ;;  %s78_s17 = int_to_ptr.vmem [resolvable:$true] %s77_s17 }
  0x6d   :  { %s5853_s18 = scalar_lea.hbm %s6443_s2, 32 }
  0x6e   :  { %p5854_p6 = scmp.ne.s32.totalorder %s6443_s2, %s5853_s18  ;;  %p5857_p7 = scmp.lt.u32.totalorder %s5853_s18, %s6443_s2 }
  0x70   :  { %p5859_p8 = pnand %p5857_p7, %p5854_p6 }
  0x72   :  { %5862 = shalt.err (!%p5859_p8)
}
  0x73   :  { %s5863_s0 = scalar_lea.vmem %s56_s16, 32  ;;  %p5868_p10 = scmp.lt.s32.totalorder %s56_s16, %s56_s16 }
  0x74   :  { %p5864_p9 = scmp.ne.s32.totalorder %s56_s16, %s5863_s0  ;;  %p5869_p11 = scmp.lt.s32.totalorder %s5863_s0, %s5863_s0 }
  0x76   :  { %p5870_p12 = por %p5869_p11, %p5868_p10 }
  0x78   :  { %p5871_p13 = pnand %p5870_p12, %p5864_p9 }
  0x7a   :  { %5874 = shalt.err (!%p5871_p13)
}
  0x7b   :  { %58 = dma.hbm_to_vmem [thread:$0]  %s6443_s2, 32, %s56_s16, [#allocation6]  }
  0x7c   :  { %s5875_s28 = scalar_lea.hbm %s6445_s4, 32 }
  0x7d   :  { %p5876_p0 = scmp.ne.s32.totalorder %s6445_s4, %s5875_s28  ;;  %p5879_p1 = scmp.lt.u32.totalorder %s5875_s28, %s6445_s4 }
  0x7f   :  { %p5881_p2 = pnand %p5879_p1, %p5876_p0 }
  0x81   :  { %5884 = shalt.err (!%p5881_p2)
}
  0x82   :  { %s5885_s3 = scalar_lea.vmem %s78_s17, 32  ;;  %p5890_p4 = scmp.lt.s32.totalorder %s78_s17, %s78_s17 }
  0x83   :  { %p5886_p3 = scmp.ne.s32.totalorder %s78_s17, %s5885_s3  ;;  %p5891_p5 = scmp.lt.s32.totalorder %s5885_s3, %s5885_s3 }
  0x85   :  { %p5892_p6 = por %p5891_p5, %p5890_p4 }
  0x87   :  { %p5893_p7 = pnand %p5892_p6, %p5886_p3 }
  0x89   :  { %5896 = shalt.err (!%p5893_p7)
}
  0x8a   :  { %80 = dma.hbm_to_vmem [thread:$0]  %s6445_s4, 32, %s78_s17, [#allocation9]  }
  0x8b   :  { %s6011_s14 = smov [#allocation13]   ;;  %s6012_s26 = smov [#allocation16]  }
  0x8c   :  { %s99_s16 = sshll.u32 %s6011_s14, 4  ;;  %s121_s20 = sshll.u32 %s6012_s26, 4  ;;  %s100_s16 = int_to_ptr.vmem [resolvable:$true] %s99_s16  ;;  %s122_s20 = int_to_ptr.vmem [resolvable:$true] %s121_s20 }
  0x8d   :  { %s5897_s19 = scalar_lea.hbm %s6447_s6, 32 }
  0x8e   :  { %p5898_p8 = scmp.ne.s32.totalorder %s6447_s6, %s5897_s19  ;;  %p5901_p9 = scmp.lt.u32.totalorder %s5897_s19, %s6447_s6 }
  0x90   :  { %p5903_p10 = pnand %p5901_p9, %p5898_p8 }
  0x92   :  { %5906 = shalt.err (!%p5903_p10)
}
  0x93   :  { %s5907_s4 = scalar_lea.vmem %s100_s16, 32  ;;  %p5912_p12 = scmp.lt.s32.totalorder %s100_s16, %s100_s16 }
  0x94   :  { %p5908_p11 = scmp.ne.s32.totalorder %s100_s16, %s5907_s4  ;;  %p5913_p13 = scmp.lt.s32.totalorder %s5907_s4, %s5907_s4 }
  0x96   :  { %p5914_p0 = por %p5913_p13, %p5912_p12 }
  0x98   :  { %p5915_p1 = pnand %p5914_p0, %p5908_p11 }
  0x9a   :  { %5918 = shalt.err (!%p5915_p1)
}
  0x9b   :  { %102 = dma.hbm_to_vmem [thread:$0]  %s6447_s6, 32, %s100_s16, [#allocation12]  }
  0x9c   :  { %s5919_s25 = scalar_lea.hbm %s6449_s8, 32 }
  0x9d   :  { %p5920_p2 = scmp.ne.s32.totalorder %s6449_s8, %s5919_s25  ;;  %p5923_p3 = scmp.lt.u32.totalorder %s5919_s25, %s6449_s8 }
  0x9f   :  { %p5925_p4 = pnand %p5923_p3, %p5920_p2 }
  0xa1   :  { %5928 = shalt.err (!%p5925_p4)
}
  0xa2   :  { %s5929_s30 = scalar_lea.vmem %s122_s20, 32  ;;  %p5934_p6 = scmp.lt.s32.totalorder %s122_s20, %s122_s20 }
  0xa3   :  { %p5930_p5 = scmp.ne.s32.totalorder %s122_s20, %s5929_s30  ;;  %p5935_p7 = scmp.lt.s32.totalorder %s5929_s30, %s5929_s30 }
  0xa5   :  { %p5936_p8 = por %p5935_p7, %p5934_p6 }
  0xa7   :  { %p5937_p9 = pnand %p5936_p8, %p5930_p5 }
  0xa9   :  { %5940 = shalt.err (!%p5937_p9)
}
  0xaa   :  { %124 = dma.hbm_to_vmem [thread:$0]  %s6449_s8, 32, %s122_s20, [#allocation15]  }
  0xab   :  { %s6013_s2 = smov [#allocation19]   ;;  %s5941_s26 = scalar_lea.hbm %s6453_s12, 16 }
  0xac   :  { %s145_s23 = sshll.u32 %s6013_s2, 4  ;;  %p5942_p10 = scmp.ne.s32.totalorder %s6453_s12, %s5941_s26  ;;  %s146_s23 = int_to_ptr.vmem [resolvable:$true] %s145_s23 }
  0xad   :  { %p5945_p11 = scmp.lt.u32.totalorder %s5941_s26, %s6453_s12 }
  0xaf   :  { %p5947_p12 = pnand %p5945_p11, %p5942_p10 }
  0xb1   :  { %5950 = shalt.err (!%p5947_p12)
}
  0xb2   :  { %s5951_s22 = scalar_lea.vmem %s146_s23, 16  ;;  %s5955_s8 = scalar_lea.vmem %s146_s23, 32 }
  0xb3   :  { %p5952_p13 = scmp.ne.s32.totalorder %s146_s23, %s5951_s22  ;;  %p5956_p0 = scmp.lt.s32.totalorder %s146_s23, %s146_s23 }
  0xb4   :  { %p5957_p1 = scmp.lt.s32.totalorder %s5955_s8, %s5951_s22 }
  0xb6   :  { %p5958_p2 = por %p5957_p1, %p5956_p0 }
  0xb8   :  { %p5959_p3 = pnand %p5958_p2, %p5952_p13 }
  0xba   :  { %5962 = shalt.err (!%p5959_p3)
}
  0xbb   :  { %148 = dma.hbm_to_vmem [thread:$0]  %s6453_s12, 16, %s146_s23, [#allocation18]  }
  0xbc   :  { %5985 = dma.done.wait [#allocation3], 3072  }
  0xbd   :  { %5986 = vsyncadd [#allocation3], 4294964224 }
  0xbe   :  { %5987 = dma.done.wait [#allocation6], 49184  }
  0xbf   :  { %5988 = vsyncadd [#allocation6], 4294918112 }
  0xc0   :  { %5989 = dma.done.wait [#allocation9], 4128  }
  0xc1   :  { %5990 = vsyncadd [#allocation9], 4294963168 }
  0xc2   :  { %5991 = dma.done.wait [#allocation12], 4128  }
  0xc3   :  { %5992 = vsyncadd [#allocation12], 4294963168 }
  0xc4   :  { %5993 = dma.done.wait [#allocation15], 4128  }
  0xc5   :  { %5994 = vsyncadd [#allocation15], 4294963168 }
  0xc6   :  { %5995 = dma.done.wait [#allocation18], 32  }
  0xc7   :  { %5996 = vsyncadd [#allocation18], 4294967264  ;;  %v4945_v0 = vld [vmem:[#allocation5 + $0x404] ss:$8 sps:$4 sm:$0xff]   ;;  %v4947_v1 = vld [vmem:[#allocation5 + $0x400] ss:$8 sps:$4 sm:$0xff]   ;;  %v238_v12 = vlaneseq }
  0xc8   :  { %2975 = vmatprep.subr.bf16.mxu0 %v4945_v0  ;;  %v4948_v2 = vld [vmem:[#allocation5 + $0x414] ss:$8 sps:$4 sm:$0xff]   ;;  %v4950_v3 = vld [vmem:[#allocation5 + $0x410] ss:$8 sps:$4 sm:$0xff]   ;;  %v4951_v4 = vld [vmem:[#allocation5 + $0x424] ss:$8 sps:$4 sm:$0xff]  }
  0xc9   :  { %2976 = vmatpush1.bf16.msra.mxu0 %v4947_v1  ;;  %v4953_v5 = vld [vmem:[#allocation5 + $0x420] ss:$8 sps:$4 sm:$0xff]   ;;  %v4954_v6 = vld [vmem:[#allocation5 + $0x434] ss:$8 sps:$4 sm:$0xff]   ;;  %v4956_v7 = vld [vmem:[#allocation5 + $0x430] ss:$8 sps:$4 sm:$0xff]  }
  0xca   :  { %2977 = vmatprep.subr.bf16.mxu0 %v4948_v2  ;;  %v4957_v8 = vld [vmem:[#allocation5 + $0x444] ss:$8 sps:$4 sm:$0xff]   ;;  %v4959_v9 = vld [vmem:[#allocation5 + $0x440] ss:$8 sps:$4 sm:$0xff]   ;;  %v6014_v10 = vmov 1983009808  }
  0xcb   :  { %v236_v11 = vunpack.c.l.s4 %v6014_v10  ;;  %v4960_v13 = vld [vmem:[#allocation5 + $0x454] ss:$8 sps:$4 sm:$0xff]   ;;  %v4962_v14 = vld [vmem:[#allocation5 + $0x450] ss:$8 sps:$4 sm:$0xff]   ;;  %v4963_v15 = vld [vmem:[#allocation5 + $0x464] ss:$8 sps:$4 sm:$0xff]  }
  0xcc   :  { %v6234_v17 = vshrl.u32 %v238_v12, 7  ;;  %v4990_v18 = vld [vmem:[#allocation5 + $0x4] ss:$8 sps:$4 sm:$0xff]   ;;  %v4965_v19 = vld [vmem:[#allocation5 + $0x460] ss:$8 sps:$4 sm:$0xff]   ;;  %vm6016_vm0 = vmmov 0  }
  0xcd   :  { %2978 = vmatpush1.bf16.msra.mxu0 %v4950_v3  ;;  %v237_v16 = vunpack.c.0.s8 %v236_v11  ;;  %v4966_v20 = vld [vmem:[#allocation5 + $0x474] ss:$8 sps:$4 sm:$0xff]   ;;  %2811 = vmatprep.subr.bf16.mxu1 %v4990_v18  ;;  %v4994_v21 = vld [vmem:[#allocation5] ss:$8 sps:$4 sm:$0xff]   ;;  %v4968_v28 = vld [vmem:[#allocation5 + $0x470] ss:$8 sps:$4 sm:$0xff]  }
  0xce   :  { %2979 = vmatprep.subr.bf16.mxu0 %v4951_v4  ;;  %v4996_v22 = vld [vmem:[#allocation5 + $0x14] ss:$8 sps:$4 sm:$0xff]   ;;  %2812 = vmatpush1.bf16.msra.mxu1 %v4994_v21  ;;  %v4998_v24 = vld [vmem:[#allocation2 + $0x10] ss:$48 sps:$4 sm:$0xff]   ;;  %v4969_v29 = vld [vmem:[#allocation5 + $0x484] ss:$8 sps:$4 sm:$0xff]  }
  0xcf   :  { %v6237_v23 = vsub.s32 %v237_v16, %v6234_v17  ;;  %2813 = vmatprep.subr.bf16.mxu1 %v4996_v22  ;;  %v5000_v25 = vld [vmem:[#allocation2 + $0x14] ss:$48 sps:$4 sm:$0xff]   ;;  %v5001_v26 = vld [vmem:[#allocation2 + $0x70] ss:$48 sps:$4 sm:$0xff]   ;;  %vm4270_vm1 = vcmask 523264   ;;  %vm4314_vm2 = vcmask 64512  }
  0xd0   :  { %v5003_v27 = vld [vmem:[#allocation2 + $0x74] ss:$48 sps:$4 sm:$0xff]   ;;  %v5007_v32 = vld [vmem:[#allocation5 + $0x10] ss:$8 sps:$4 sm:$0xff]   ;;  %v4971_v37 = vld [vmem:[#allocation5 + $0x480] ss:$8 sps:$4 sm:$0xff]  }
  0xd1   :  { %2980 = vmatpush1.bf16.msra.mxu0 %v4953_v5  ;;  %v6240_v30 = vrot.slane %v4998_v24, %v6237_v23  ;;  %v6243_v31 = vrot.slane %v5001_v26, %v6237_v23  ;;  %v6246_v33 = vrot.slane %v5000_v25, %v6237_v23  ;;  %v5008_v34 = vld [vmem:[#allocation5 + $0x24] ss:$8 sps:$4 sm:$0xff]   ;;  %v6249_v35 = vrot.slane %v5003_v27, %v6237_v23  ;;  %v5013_v38 = vld [vmem:[#allocation5 + $0x20] ss:$8 sps:$4 sm:$0xff]   ;;  %v5014_v41 = vld [vmem:[#allocation5 + $0x34] ss:$8 sps:$4 sm:$0xff]  }
  0xd2   :  { %2981 = vmatprep.subr.bf16.mxu0 %v4954_v6  ;;  %2814 = vmatpush1.bf16.msra.mxu1 %v5007_v32  ;;  %v4972_v42 = vld [vmem:[#allocation5 + $0x494] ss:$8 sps:$4 sm:$0xff]   ;;  %v5019_v43 = vld [vmem:[#allocation5 + $0x30] ss:$8 sps:$4 sm:$0xff]   ;;  %v5020_v44 = vld [vmem:[#allocation5 + $0x44] ss:$8 sps:$4 sm:$0xff]  }
  0xd3   :  { %v336_v36 = vcombine.high %v6240_v30, %v6243_v31  ;;  %2815 = vmatprep.subr.bf16.mxu1 %v5008_v34  ;;  %v6255_v39 = vcombine.low %v6246_v33, %v6249_v35  ;;  %v4974_v45 = vld [vmem:[#allocation5 + $0x490] ss:$8 sps:$4 sm:$0xff]   ;;  %v4975_v46 = vld [vmem:[#allocation5 + $0x4a4] ss:$8 sps:$4 sm:$0xff]   ;;  %v5025_v47 = vld [vmem:[#allocation5 + $0x40] ss:$8 sps:$4 sm:$0xff]   ;;  %v335_v4 = vcombine.low %v6240_v30, %v6243_v31 }
  0xd4   :  { %v5026_v48 = vld [vmem:[#allocation5 + $0x54] ss:$8 sps:$4 sm:$0xff]   ;;  %v4977_v49 = vld [vmem:[#allocation5 + $0x4a0] ss:$8 sps:$4 sm:$0xff]   ;;  %v5031_v51 = vld [vmem:[#allocation5 + $0x50] ss:$8 sps:$4 sm:$0xff]  }
  0xd5   :  { %2982 = vmatpush1.bf16.msra.mxu0 %v4956_v7  ;;  %v480_v40 = vpack.c.bf16 %v336_v36, %v336_v36  ;;  %v4978_v50 = vld [vmem:[#allocation5 + $0x4b4] ss:$8 sps:$4 sm:$0xff]   ;;  %v5032_v52 = vld [vmem:[#allocation5 + $0x64] ss:$8 sps:$4 sm:$0xff]   ;;  %v4980_v53 = vld [vmem:[#allocation5 + $0x4b0] ss:$8 sps:$4 sm:$0xff]   ;;  %v338_v7 = vcombine.high %v6246_v33, %v6249_v35  ;;  %v479_v10 = vpack.c.bf16 %v335_v4, %v335_v4 }
  0xd6   :  { %2983 = vmatprep.subr.bf16.mxu0 %v4957_v8  ;;  %2816 = vmatpush1.bf16.msra.mxu1 %v5013_v38  ;;  %v4981_v54 = vld [vmem:[#allocation5 + $0x4c4] ss:$8 sps:$4 sm:$0xff]   ;;  %v5037_v55 = vld [vmem:[#allocation5 + $0x60] ss:$8 sps:$4 sm:$0xff]   ;;  %v5038_v56 = vld [vmem:[#allocation5 + $0x74] ss:$8 sps:$4 sm:$0xff]  }
  0xd7   :  { %3007 = vmatprep.mubr.bf16.mxu0 %v480_v40  ;;  %2817 = vmatprep.subr.bf16.mxu1 %v5014_v41  ;;  %v4983_v57 = vld [vmem:[#allocation5 + $0x4c0] ss:$8 sps:$4 sm:$0xff]   ;;  %v4984_v58 = vld [vmem:[#allocation5 + $0x4d4] ss:$8 sps:$4 sm:$0xff]   ;;  %v5043_v59 = vld [vmem:[#allocation5 + $0x70] ss:$8 sps:$4 sm:$0xff]  }
  0xd8   :  { %v5044_v60 = vld [vmem:[#allocation5 + $0x84] ss:$8 sps:$4 sm:$0xff]   ;;  %v4986_v61 = vld [vmem:[#allocation5 + $0x4d0] ss:$8 sps:$4 sm:$0xff]   ;;  %v5049_v63 = vld [vmem:[#allocation5 + $0x80] ss:$8 sps:$4 sm:$0xff]  }
  0xd9   :  { %2984 = vmatpush1.bf16.msra.mxu0 %v4959_v9  ;;  %v4987_v62 = vld [vmem:[#allocation5 + $0x4e4] ss:$8 sps:$4 sm:$0xff]   ;;  %v5050_v0 = vld [vmem:[#allocation5 + $0x94] ss:$8 sps:$4 sm:$0xff]   ;;  %v4989_v1 = vld [vmem:[#allocation5 + $0x4e0] ss:$8 sps:$4 sm:$0xff]  }
  0xda   :  { %2985 = vmatprep.subr.bf16.mxu0 %v4960_v13  ;;  %2818 = vmatpush1.bf16.msra.mxu1 %v5019_v43  ;;  %v4992_v2 = vld [vmem:[#allocation5 + $0x4f4] ss:$8 sps:$4 sm:$0xff]   ;;  %v5055_v3 = vld [vmem:[#allocation5 + $0x90] ss:$8 sps:$4 sm:$0xff]   ;;  %v5056_v5 = vld [vmem:[#allocation5 + $0xa4] ss:$8 sps:$4 sm:$0xff]   ;;  %v482_v13 = vpack.c.bf16 %v338_v7, %v338_v7 }
  0xdb   :  { %2819 = vmatprep.subr.bf16.mxu1 %v5020_v44  ;;  %v4995_v6 = vld [vmem:[#allocation5 + $0x4f0] ss:$8 sps:$4 sm:$0xff]   ;;  %v5006_v8 = vld [vmem:[#allocation5 + $0x504] ss:$8 sps:$4 sm:$0xff]   ;;  %v5061_v9 = vld [vmem:[#allocation5 + $0xa0] ss:$8 sps:$4 sm:$0xff]  }
  0xdc   :  { %v5062_v11 = vld [vmem:[#allocation5 + $0xb4] ss:$8 sps:$4 sm:$0xff]   ;;  %v5004_v12 = vld [vmem:[#allocation5 + $0x500] ss:$8 sps:$4 sm:$0xff]   ;;  %v5010_v16 = vld [vmem:[#allocation5 + $0x510] ss:$8 sps:$4 sm:$0xff]  }
  0xdd   :  { %2986 = vmatpush1.bf16.msra.mxu0 %v4962_v14  ;;  %v5012_v14 = vld [vmem:[#allocation5 + $0x514] ss:$8 sps:$4 sm:$0xff]   ;;  %v5068_v18 = vld [vmem:[#allocation5 + $0xc4] ss:$8 sps:$4 sm:$0xff]   ;;  %v5095_v21 = vld [vmem:[#allocation2 + $0x60] ss:$48 sps:$4 sm:$0xff]  }
  0xde   :  { %2987 = vmatprep.subr.bf16.mxu0 %v4963_v15  ;;  %2820 = vmatpush1.bf16.msra.mxu1 %v5025_v47  ;;  %v5067_v15 = vld [vmem:[#allocation5 + $0xb0] ss:$8 sps:$4 sm:$0xff]   ;;  %v5097_v22 = vld [vmem:[#allocation2 + $0x64] ss:$48 sps:$4 sm:$0xff]   ;;  %v5073_v26 = vld [vmem:[#allocation5 + $0xc0] ss:$8 sps:$4 sm:$0xff]   ;;  %v255_v27 = vrot.slane %v5095_v21, %v6237_v23 }
  0xdf   :  { %2821 = vmatprep.subr.bf16.mxu1 %v5026_v48  ;;  %v5018_v24 = vld [vmem:[#allocation5 + $0x524] ss:$8 sps:$4 sm:$0xff]   ;;  %v5074_v30 = vld [vmem:[#allocation5 + $0xd4] ss:$8 sps:$4 sm:$0xff]   ;;  %v5016_v31 = vld [vmem:[#allocation5 + $0x520] ss:$8 sps:$4 sm:$0xff]  }
  0xe0   :  { %v5024_v34 = vld [vmem:[#allocation5 + $0x534] ss:$8 sps:$4 sm:$0xff]   ;;  %v5079_v35 = vld [vmem:[#allocation5 + $0xd0] ss:$8 sps:$4 sm:$0xff]   ;;  %v5030_v40 = vld [vmem:[#allocation5 + $0x544] ss:$8 sps:$4 sm:$0xff]  }
  0xe1   :  { %2988 = vmatpush1.bf16.msra.mxu0 %v4965_v19  ;;  %v5092_v19 = vld [vmem:[#allocation2] ss:$48 sps:$4 sm:$0xff]   ;;  %v5036_v44 = vld [vmem:[#allocation5 + $0x554] ss:$8 sps:$4 sm:$0xff]   ;;  %v5100_v48 = vld [vmem:[#allocation5 + $0x104] ss:$8 sps:$4 sm:$0xff]  }
  0xe2   :  { %2989 = vmatprep.subr.bf16.mxu0 %v4966_v20  ;;  %2822 = vmatpush1.bf16.msra.mxu1 %v5031_v51  ;;  %v5094_v20 = vld [vmem:[#allocation2 + $0x4] ss:$48 sps:$4 sm:$0xff]   ;;  %v241_v25 = vrot.slane %v5092_v19, %v6237_v23  ;;  %v5022_v38 = vld [vmem:[#allocation5 + $0x530] ss:$8 sps:$4 sm:$0xff]   ;;  %v5085_v41 = vld [vmem:[#allocation5 + $0xe0] ss:$8 sps:$4 sm:$0xff]  }
  0xe3   :  { %2823 = vmatprep.subr.bf16.mxu1 %v5032_v52  ;;  %v5028_v43 = vld [vmem:[#allocation5 + $0x540] ss:$8 sps:$4 sm:$0xff]   ;;  %v5066_v4 = vld [vmem:[#allocation5 + $0x5a4] ss:$8 sps:$4 sm:$0xff]   ;;  %v5140_v19 = vld [vmem:[#allocation5 + $0x170] ss:$8 sps:$4 sm:$0xff]  }
  0xe4   :  { %v264_v32 = vcombine.high %v241_v25, %v255_v27  ;;  %v5098_v52 = vld [vmem:[#allocation5 + $0x100] ss:$8 sps:$4 sm:$0xff]   ;;  %v5148_v21 = vld [vmem:[#allocation5 + $0x184] ss:$8 sps:$4 sm:$0xff]  }
  0xe5   :  { %2990 = vmatpush1.bf16.msra.mxu0 %v4968_v28  ;;  %v248_v28 = vrot.slane %v5094_v20, %v6237_v23  ;;  %v5064_v7 = vld [vmem:[#allocation5 + $0x5a0] ss:$8 sps:$4 sm:$0xff]   ;;  %v5090_v20 = vld [vmem:[#allocation5 + $0x5e4] ss:$8 sps:$4 sm:$0xff]  }
  0xe6   :  { %2991 = vmatprep.subr.bf16.mxu0 %v4969_v29  ;;  %2824 = vmatpush1.bf16.msra.mxu1 %v5037_v55  ;;  %v262_v29 = vrot.slane %v5097_v22, %v6237_v23  ;;  %v472_v36 = vpack.c.bf16 %v264_v32, %v264_v32  ;;  %v5040_v55 = vld [vmem:[#allocation5 + $0x560] ss:$8 sps:$4 sm:$0xff]   ;;  %v5152_v32 = vld [vmem:[#allocation5 + $0x190] ss:$8 sps:$4 sm:$0xff]  }
  0xe7   :  { %2825 = vmatprep.subr.bf16.mxu1 %v5038_v56  ;;  %v5048_v56 = vld [vmem:[#allocation5 + $0x574] ss:$8 sps:$4 sm:$0xff]   ;;  %v5203_v22 = vld [vmem:[#allocation2 + $0x18] ss:$48 sps:$4 sm:$0xff]  }
  0xe8   :  { %v6265_v33 = vcombine.low %v248_v28, %v262_v29  ;;  %2843 = vmatprep.mubr.bf16.mxu1 %v472_v36  ;;  %v266_v47 = vcombine.high %v248_v28, %v262_v29  ;;  %v5088_v29 = vld [vmem:[#allocation5 + $0x5e0] ss:$8 sps:$4 sm:$0xff]  }
  0xe9   :  { %2992 = vmatpush1.bf16.msra.mxu0 %v4971_v37  ;;  %v5080_v37 = vld [vmem:[#allocation5 + $0xe4] ss:$8 sps:$4 sm:$0xff]  }
  0xea   :  { %2993 = vmatprep.subr.bf16.mxu0 %v4972_v42  ;;  %2826 = vmatpush1.bf16.msra.mxu1 %v5043_v59  ;;  %v5086_v42 = vld [vmem:[#allocation5 + $0xf4] ss:$8 sps:$4 sm:$0xff]   ;;  %v5046_v59 = vld [vmem:[#allocation5 + $0x570] ss:$8 sps:$4 sm:$0xff]  }
  0xeb   :  { %2827 = vmatprep.subr.bf16.mxu1 %v5044_v60  ;;  %v5054_v60 = vld [vmem:[#allocation5 + $0x584] ss:$8 sps:$4 sm:$0xff]  }
  0xed   :  { %2994 = vmatpush1.bf16.msra.mxu0 %v4974_v45  ;;  %v263_v45 = vcombine.low %v241_v25, %v255_v27  ;;  %v5146_v25 = vld [vmem:[#allocation5 + $0x180] ss:$8 sps:$4 sm:$0xff]   ;;  %v349_v27 = vrot.slane %v5203_v22, %v6237_v23  ;;  %v5161_v22 = vld [vmem:[#allocation5 + $0x690] ss:$8 sps:$4 sm:$0xff]  }
  0xee   :  { %2995 = vmatprep.subr.bf16.mxu0 %v4975_v46  ;;  %2828 = vmatpush1.bf16.msra.mxu1 %v5049_v63  ;;  %v5091_v46 = vld [vmem:[#allocation5 + $0xf0] ss:$8 sps:$4 sm:$0xff]   ;;  %v5052_v63 = vld [vmem:[#allocation5 + $0x580] ss:$8 sps:$4 sm:$0xff]  }
  0xef   :  { %2829 = vmatprep.subr.bf16.mxu1 %v5050_v0  ;;  %v471_v51 = vpack.c.bf16 %v263_v45, %v263_v45  ;;  %v5060_v0 = vld [vmem:[#allocation5 + $0x594] ss:$8 sps:$4 sm:$0xff]   ;;  %v5164_v45 = vld [vmem:[#allocation5 + $0x1b0] ss:$8 sps:$4 sm:$0xff]  }
  0xf1   :  { %2996 = vmatpush1.bf16.msra.mxu0 %v4977_v49  ;;  %v5034_v49 = vld [vmem:[#allocation5 + $0x550] ss:$8 sps:$4 sm:$0xff]  }
  0xf2   :  { %2997 = vmatprep.subr.bf16.mxu0 %v4978_v50  ;;  %2830 = vmatpush1.bf16.msra.mxu1 %v5055_v3  ;;  %v5042_v50 = vld [vmem:[#allocation5 + $0x564] ss:$8 sps:$4 sm:$0xff]   ;;  %v5058_v3 = vld [vmem:[#allocation5 + $0x590] ss:$8 sps:$4 sm:$0xff]  }
  0xf3   :  { %2831 = vmatprep.subr.bf16.mxu1 %v5056_v5  ;;  %v5122_v5 = vld [vmem:[#allocation5 + $0x140] ss:$8 sps:$4 sm:$0xff]  }
  0xf5   :  { %2998 = vmatpush1.bf16.msra.mxu0 %v4980_v53  ;;  %v474_v53 = vpack.c.bf16 %v266_v47, %v266_v47  ;;  %v5113_v47 = vld [vmem:[#allocation5 + $0x610] ss:$8 sps:$4 sm:$0xff]  }
  0xf6   :  { %2999 = vmatprep.subr.bf16.mxu0 %v4981_v54  ;;  %2832 = vmatpush1.bf16.msra.mxu1 %v5061_v9  ;;  %v5106_v54 = vld [vmem:[#allocation5 + $0x114] ss:$8 sps:$4 sm:$0xff]   ;;  %v5128_v9 = vld [vmem:[#allocation5 + $0x150] ss:$8 sps:$4 sm:$0xff]  }
  0xf7   :  { %2833 = vmatprep.subr.bf16.mxu1 %v5062_v11  ;;  %v5070_v11 = vld [vmem:[#allocation5 + $0x5b0] ss:$8 sps:$4 sm:$0xff]  }
  0xf9   :  { %3000 = vmatpush1.bf16.msra.mxu0 %v4983_v57  ;;  %v5104_v57 = vld [vmem:[#allocation5 + $0x110] ss:$8 sps:$4 sm:$0xff]  }
  0xfa   :  { %3001 = vmatprep.subr.bf16.mxu0 %v4984_v58  ;;  %2834 = vmatpush1.bf16.msra.mxu1 %v5067_v15  ;;  %v5112_v58 = vld [vmem:[#allocation5 + $0x124] ss:$8 sps:$4 sm:$0xff]   ;;  %v5076_v15 = vld [vmem:[#allocation5 + $0x5c0] ss:$8 sps:$4 sm:$0xff]  }
  0xfb   :  { %2835 = vmatprep.subr.bf16.mxu1 %v5068_v18  ;;  %v5082_v18 = vld [vmem:[#allocation5 + $0x5d0] ss:$8 sps:$4 sm:$0xff]  }
  0xfd   :  { %3002 = vmatpush1.bf16.msra.mxu0 %v4986_v61  ;;  %v5110_v61 = vld [vmem:[#allocation5 + $0x120] ss:$8 sps:$4 sm:$0xff]  }
  0xfe   :  { %3003 = vmatprep.subr.bf16.mxu0 %v4987_v62  ;;  %2836 = vmatpush1.bf16.msra.mxu1 %v5073_v26  ;;  %v5118_v62 = vld [vmem:[#allocation5 + $0x134] ss:$8 sps:$4 sm:$0xff]  }
  0xff   :  { %2837 = vmatprep.subr.bf16.mxu1 %v5074_v30  ;;  %v5154_v26 = vld [vmem:[#allocation5 + $0x194] ss:$8 sps:$4 sm:$0xff]  }
 0x100   :  { %v5103_v30 = vld [vmem:[#allocation5 + $0x5f4] ss:$8 sps:$4 sm:$0xff]  }
 0x101   :  { %3004 = vmatpush1.bf16.msra.mxu0 %v4989_v1  ;;  %v5116_v1 = vld [vmem:[#allocation5 + $0x130] ss:$8 sps:$4 sm:$0xff]  }
 0x102   :  { %3005 = vmatprep.subr.bf16.mxu0 %v4992_v2  ;;  %2838 = vmatpush1.bf16.msra.mxu1 %v5079_v35  ;;  %v5124_v2 = vld [vmem:[#allocation5 + $0x144] ss:$8 sps:$4 sm:$0xff]   ;;  %v5101_v35 = vld [vmem:[#allocation5 + $0x5f0] ss:$8 sps:$4 sm:$0xff]  }
 0x103   :  { %2839 = vmatprep.subr.bf16.mxu1 %v5080_v37  ;;  %v5109_v37 = vld [vmem:[#allocation5 + $0x604] ss:$8 sps:$4 sm:$0xff]  }
 0x105   :  { %3006 = vmatpush1.bf16.msra.mxu0 %v4995_v6  ;;  %v5130_v6 = vld [vmem:[#allocation5 + $0x154] ss:$8 sps:$4 sm:$0xff]  }
 0x106   :  { %3016 = vmatprep.subr.bf16.mxu0 %v5006_v8  ;;  %2840 = vmatpush1.bf16.msra.mxu1 %v5085_v41  ;;  %v5072_v8 = vld [vmem:[#allocation5 + $0x5b4] ss:$8 sps:$4 sm:$0xff]  }
 0x107   :  { %2841 = vmatprep.subr.bf16.mxu1 %v5086_v42  ;;  %v5166_v41 = vld [vmem:[#allocation5 + $0x1b4] ss:$8 sps:$4 sm:$0xff]   ;;  %v5107_v42 = vld [vmem:[#allocation5 + $0x600] ss:$8 sps:$4 sm:$0xff]  }
 0x108   :  { %3008 = vmatmul.mubr.bf16.vlgmr.msra.gmra.mrb[0].mxu0 %v479_v10  ;;  %v5136_v10 = vld [vmem:[#allocation5 + $0x164] ss:$8 sps:$4 sm:$0xff]  }
 0x109   :  { %3017 = vmatpush1.bf16.msra.mxu0 %v5004_v12  ;;  %3048 = vmatprep.mubr.bf16.mxu0 %v482_v13  ;;  %v5078_v12 = vld [vmem:[#allocation5 + $0x5c4] ss:$8 sps:$4 sm:$0xff]   ;;  %v5134_v13 = vld [vmem:[#allocation5 + $0x160] ss:$8 sps:$4 sm:$0xff]  }
 0x10a   :  { %3018 = vmatprep.subr.bf16.mxu0 %v5012_v14  ;;  %2842 = vmatpush1.bf16.msra.mxu1 %v5091_v46  ;;  %v5142_v14 = vld [vmem:[#allocation5 + $0x174] ss:$8 sps:$4 sm:$0xff]   ;;  %v5172_v46 = vld [vmem:[#allocation5 + $0x1c4] ss:$8 sps:$4 sm:$0xff]  }
 0x10b   :  { %2852 = vmatprep.subr.bf16.mxu1 %v5100_v48  ;;  %v5121_v48 = vld [vmem:[#allocation5 + $0x624] ss:$8 sps:$4 sm:$0xff]  }
 0x10d   :  { %3019 = vmatpush1.bf16.msra.mxu0 %v5010_v16  ;;  %2844 = vmatmul.mubr.bf16.vlgmr.msra.gmra.mrb[0].mxu1 %v471_v51  ;;  %v5084_v16 = vld [vmem:[#allocation5 + $0x5d4] ss:$8 sps:$4 sm:$0xff]  }
 0x10e   :  { %3020 = vmatprep.subr.bf16.mxu0 %v5018_v24  ;;  %2853 = vmatpush1.bf16.msra.mxu1 %v5098_v52  ;;  %v5205_v24 = vld [vmem:[#allocation2 + $0x78] ss:$48 sps:$4 sm:$0xff]   ;;  %v5127_v51 = vld [vmem:[#allocation5 + $0x634] ss:$8 sps:$4 sm:$0xff]  }
 0x10f   :  { %2884 = vmatprep.mubr.bf16.mxu1 %v474_v53  ;;  %2854 = vmatprep.subr.bf16.mxu1 %v5106_v54  ;;  %v363_v28 = vrot.slane %v5205_v24, %v6237_v23  ;;  %v5176_v52 = vld [vmem:[#allocation5 + $0x1d0] ss:$8 sps:$4 sm:$0xff]   ;;  %v5184_v53 = vld [vmem:[#allocation5 + $0x1e4] ss:$8 sps:$4 sm:$0xff]  }
 0x110   :  { %v5125_v54 = vld [vmem:[#allocation5 + $0x630] ss:$8 sps:$4 sm:$0xff]  }
 0x111   :  { %3021 = vmatpush1.bf16.msra.mxu0 %v5016_v31  ;;  %v6269_v31 = vcombine.low %v349_v27, %v363_v28  ;;  %v372_v36 = vcombine.high %v349_v27, %v363_v28  ;;  %v5169_v27 = vld [vmem:[#allocation5 + $0x6a4] ss:$8 sps:$4 sm:$0xff]   ;;  %v5222_v28 = vld [vmem:[#allocation5 + $0x240] ss:$8 sps:$4 sm:$0xff]  }
 0x112   :  { %3022 = vmatprep.subr.bf16.mxu0 %v5024_v34  ;;  %2855 = vmatpush1.bf16.msra.mxu1 %v5104_v57  ;;  %v5160_v34 = vld [vmem:[#allocation5 + $0x1a4] ss:$8 sps:$4 sm:$0xff]   ;;  %v5190_v57 = vld [vmem:[#allocation5 + $0x1f4] ss:$8 sps:$4 sm:$0xff]  }
 0x113   :  { %2856 = vmatprep.subr.bf16.mxu1 %v5112_v58  ;;  %v5131_v58 = vld [vmem:[#allocation5 + $0x640] ss:$8 sps:$4 sm:$0xff]  }
 0x115   :  { %3023 = vmatpush1.bf16.msra.mxu0 %v5022_v38  ;;  %v5158_v38 = vld [vmem:[#allocation5 + $0x1a0] ss:$8 sps:$4 sm:$0xff]  }
 0x116   :  { %3024 = vmatprep.subr.bf16.mxu0 %v5030_v40  ;;  %2857 = vmatpush1.bf16.msra.mxu1 %v5110_v61  ;;  %v481_v40 = vpack.c.bf16 %v6255_v39, %v6255_v39  ;;  %v5178_v39 = vld [vmem:[#allocation5 + $0x1d4] ss:$8 sps:$4 sm:$0xff]   ;;  %v5196_v61 = vld [vmem:[#allocation5 + $0x204] ss:$8 sps:$4 sm:$0xff]  }
 0x117   :  { %2858 = vmatprep.subr.bf16.mxu1 %v5118_v62  ;;  %v5137_v62 = vld [vmem:[#allocation5 + $0x650] ss:$8 sps:$4 sm:$0xff]  }
 0x119   :  { %3025 = vmatpush1.bf16.msra.mxu0 %v5028_v43  ;;  %v484_v43 = vpack.c.bf16 %v372_v36, %v372_v36  ;;  %v5236_v36 = vld [vmem:[#allocation5 + $0x264] ss:$8 sps:$4 sm:$0xff]  }
 0x11a   :  { %3026 = vmatprep.subr.bf16.mxu0 %v5036_v44  ;;  %2859 = vmatpush1.bf16.msra.mxu1 %v5116_v1  ;;  %v5115_v44 = vld [vmem:[#allocation5 + $0x614] ss:$8 sps:$4 sm:$0xff]   ;;  %v5194_v1 = vld [vmem:[#allocation5 + $0x200] ss:$8 sps:$4 sm:$0xff]  }
 0x11b   :  { %2860 = vmatprep.subr.bf16.mxu1 %v5124_v2  ;;  %v5202_v2 = vld [vmem:[#allocation5 + $0x214] ss:$8 sps:$4 sm:$0xff]  }
 0x11d   :  { %3027 = vmatpush1.bf16.msra.mxu0 %v5034_v49  ;;  %v5170_v49 = vld [vmem:[#allocation5 + $0x1c0] ss:$8 sps:$4 sm:$0xff]  }
 0x11e   :  { %3028 = vmatprep.subr.bf16.mxu0 %v5042_v50  ;;  %2861 = vmatpush1.bf16.msra.mxu1 %v5122_v5  ;;  %v5119_v50 = vld [vmem:[#allocation5 + $0x620] ss:$8 sps:$4 sm:$0xff]   ;;  %v5149_v5 = vld [vmem:[#allocation5 + $0x670] ss:$8 sps:$4 sm:$0xff]  }
 0x11f   :  { %2862 = vmatprep.subr.bf16.mxu1 %v5130_v6  ;;  %v5200_v6 = vld [vmem:[#allocation5 + $0x210] ss:$8 sps:$4 sm:$0xff]  }
 0x121   :  { %3029 = vmatpush1.bf16.msra.mxu0 %v5040_v55  ;;  %v5133_v55 = vld [vmem:[#allocation5 + $0x644] ss:$8 sps:$4 sm:$0xff]  }
 0x122   :  { %3030 = vmatprep.subr.bf16.mxu0 %v5048_v56  ;;  %2863 = vmatpush1.bf16.msra.mxu1 %v5128_v9  ;;  %v5182_v56 = vld [vmem:[#allocation5 + $0x1e0] ss:$8 sps:$4 sm:$0xff]  }
 0x123   :  { %2864 = vmatprep.subr.bf16.mxu1 %v5136_v10  ;;  %v5210_v9 = vld [vmem:[#allocation5 + $0x220] ss:$8 sps:$4 sm:$0xff]  }
 0x124   :  { %v5294_v10 = vld [vmem:[#allocation2 + $0x8] ss:$48 sps:$4 sm:$0xff]  }
 0x125   :  { %3031 = vmatpush1.bf16.msra.mxu0 %v5046_v59  ;;  %v5139_v59 = vld [vmem:[#allocation5 + $0x654] ss:$8 sps:$4 sm:$0xff]  }
 0x126   :  { %3032 = vmatprep.subr.bf16.mxu0 %v5054_v60  ;;  %2865 = vmatpush1.bf16.msra.mxu1 %v5134_v13  ;;  %v5188_v60 = vld [vmem:[#allocation5 + $0x1f0] ss:$8 sps:$4 sm:$0xff]   ;;  %v5155_v13 = vld [vmem:[#allocation5 + $0x680] ss:$8 sps:$4 sm:$0xff]  }
 0x127   :  { %2866 = vmatprep.subr.bf16.mxu1 %v5142_v14 }
 0x129   :  { %3033 = vmatpush1.bf16.msra.mxu0 %v5052_v63  ;;  %v5145_v63 = vld [vmem:[#allocation5 + $0x664] ss:$8 sps:$4 sm:$0xff]  }
 0x12a   :  { %3034 = vmatprep.subr.bf16.mxu0 %v5060_v0  ;;  %2867 = vmatpush1.bf16.msra.mxu1 %v5140_v19  ;;  %v473_v0 = vpack.c.bf16 %v6265_v33, %v6265_v33  ;;  %v5296_v33 = vld [vmem:[#allocation2 + $0x68] ss:$48 sps:$4 sm:$0xff]   ;;  %v5307_v19 = vld [vmem:[#allocation2 + $0x1c] ss:$48 sps:$4 sm:$0xff]  }
 0x12b   :  { %2868 = vmatprep.subr.bf16.mxu1 %v5148_v21  ;;  %v6279_v14 = vrot.slane %v5296_v33, %v6237_v23  ;;  %v5224_v21 = vld [vmem:[#allocation5 + $0x244] ss:$8 sps:$4 sm:$0xff]  }
 0x12d   :  { %3035 = vmatpush1.bf16.msra.mxu0 %v5058_v3  ;;  %v5143_v3 = vld [vmem:[#allocation5 + $0x660] ss:$8 sps:$4 sm:$0xff]  }
 0x12e   :  { %3036 = vmatprep.subr.bf16.mxu0 %v5066_v4  ;;  %2869 = vmatpush1.bf16.msra.mxu1 %v5146_v25  ;;  %v5151_v4 = vld [vmem:[#allocation5 + $0x674] ss:$8 sps:$4 sm:$0xff]   ;;  %v356_v25 = vrot.slane %v5307_v19, %v6237_v23 }
 0x12f   :  { %2870 = vmatprep.subr.bf16.mxu1 %v5154_v26  ;;  %v5290_v19 = vld [vmem:[#allocation5 + $0x2f4] ss:$8 sps:$4 sm:$0xff]  }
 0x131   :  { %3037 = vmatpush1.bf16.msra.mxu0 %v5064_v7  ;;  %v5157_v7 = vld [vmem:[#allocation5 + $0x684] ss:$8 sps:$4 sm:$0xff]  }
 0x132   :  { %3038 = vmatprep.subr.bf16.mxu0 %v5072_v8  ;;  %2871 = vmatpush1.bf16.msra.mxu1 %v5152_v32  ;;  %v5212_v8 = vld [vmem:[#allocation5 + $0x224] ss:$8 sps:$4 sm:$0xff]   ;;  %v5167_v32 = vld [vmem:[#allocation5 + $0x6a0] ss:$8 sps:$4 sm:$0xff]  }
 0x133   :  { %2872 = vmatprep.subr.bf16.mxu1 %v5160_v34  ;;  %v5175_v34 = vld [vmem:[#allocation5 + $0x6b4] ss:$8 sps:$4 sm:$0xff]  }
 0x135   :  { %3039 = vmatpush1.bf16.msra.mxu0 %v5070_v11  ;;  %v5218_v11 = vld [vmem:[#allocation5 + $0x234] ss:$8 sps:$4 sm:$0xff]  }
 0x136   :  { %3040 = vmatprep.subr.bf16.mxu0 %v5078_v12  ;;  %2873 = vmatpush1.bf16.msra.mxu1 %v5158_v38  ;;  %v6276_v12 = vrot.slane %v5294_v10, %v6237_v23  ;;  %v5181_v38 = vld [vmem:[#allocation5 + $0x6c4] ss:$8 sps:$4 sm:$0xff]  }
 0x137   :  { %2874 = vmatprep.subr.bf16.mxu1 %v5166_v41  ;;  %v5242_v41 = vld [vmem:[#allocation5 + $0x274] ss:$8 sps:$4 sm:$0xff]   ;;  %v5284_v10 = vld [vmem:[#allocation5 + $0x2e4] ss:$8 sps:$4 sm:$0xff]  }
 0x139   :  { %3041 = vmatpush1.bf16.msra.mxu0 %v5076_v15  ;;  %v5163_v15 = vld [vmem:[#allocation5 + $0x694] ss:$8 sps:$4 sm:$0xff]  }
 0x13a   :  { %3042 = vmatprep.subr.bf16.mxu0 %v5084_v16  ;;  %2875 = vmatpush1.bf16.msra.mxu1 %v5164_v45  ;;  %v5216_v16 = vld [vmem:[#allocation5 + $0x230] ss:$8 sps:$4 sm:$0xff]   ;;  %v5248_v45 = vld [vmem:[#allocation5 + $0x284] ss:$8 sps:$4 sm:$0xff]  }
 0x13b   :  { %2876 = vmatprep.subr.bf16.mxu1 %v5172_v46  ;;  %v5185_v46 = vld [vmem:[#allocation5 + $0x6d0] ss:$8 sps:$4 sm:$0xff]  }
 0x13d   :  { %3043 = vmatpush1.bf16.msra.mxu0 %v5082_v18  ;;  %v300_v18 = vcombine.high %v6276_v12, %v6279_v14 }
 0x13e   :  { %3044 = vmatprep.subr.bf16.mxu0 %v5090_v20  ;;  %2877 = vmatpush1.bf16.msra.mxu1 %v5170_v49  ;;  %v5308_v20 = vld [vmem:[#allocation2 + $0x7c] ss:$48 sps:$4 sm:$0xff]  }
 0x13f   :  { %2878 = vmatprep.subr.bf16.mxu1 %v5178_v39  ;;  %v476_v24 = vpack.c.bf16 %v300_v18, %v300_v18  ;;  %v370_v26 = vrot.slane %v5308_v20, %v6237_v23  ;;  %v5254_v49 = vld [vmem:[#allocation5 + $0x294] ss:$8 sps:$4 sm:$0xff]   ;;  %v5191_v39 = vld [vmem:[#allocation5 + $0x6e0] ss:$8 sps:$4 sm:$0xff]  }
 0x141   :  { %3045 = vmatpush1.bf16.msra.mxu0 %v5088_v29  ;;  %v6285_v29 = vcombine.low %v356_v25, %v370_v26 }
 0x142   :  { %3046 = vmatprep.subr.bf16.mxu0 %v5103_v30  ;;  %2879 = vmatpush1.bf16.msra.mxu1 %v5176_v52  ;;  %v5230_v30 = vld [vmem:[#allocation5 + $0x254] ss:$8 sps:$4 sm:$0xff]   ;;  %v5260_v52 = vld [vmem:[#allocation5 + $0x2a4] ss:$8 sps:$4 sm:$0xff]  }
 0x143   :  { %2880 = vmatprep.subr.bf16.mxu1 %v5184_v53  ;;  %v5197_v53 = vld [vmem:[#allocation5 + $0x6f0] ss:$8 sps:$4 sm:$0xff]  }
 0x145   :  { %3047 = vmatpush1.bf16.msra.mxu0 %v5101_v35  ;;  %v5228_v35 = vld [vmem:[#allocation5 + $0x250] ss:$8 sps:$4 sm:$0xff]  }
 0x146   :  { %3057 = vmatprep.subr.bf16.mxu0 %v5109_v37  ;;  %2881 = vmatpush1.bf16.msra.mxu1 %v5182_v56  ;;  %v5173_v37 = vld [vmem:[#allocation5 + $0x6b0] ss:$8 sps:$4 sm:$0xff]   ;;  %v5258_v56 = vld [vmem:[#allocation5 + $0x2a0] ss:$8 sps:$4 sm:$0xff]  }
 0x147   :  { %2882 = vmatprep.subr.bf16.mxu1 %v5190_v57  ;;  %v483_v57 = vpack.c.bf16 %v6269_v31, %v6269_v31  ;;  %v5278_v31 = vld [vmem:[#allocation5 + $0x2d4] ss:$8 sps:$4 sm:$0xff]  }
 0x148   :  { %3049 = vmatmul.mubr.bf16.vlgmr.msra.gmra.mrb[0].mxu0 %v481_v40  ;;  %v5234_v40 = vld [vmem:[#allocation5 + $0x260] ss:$8 sps:$4 sm:$0xff]  }
 0x149   :  { %3058 = vmatpush1.bf16.msra.mxu0 %v5107_v42  ;;  %3089 = vmatprep.mubr.bf16.mxu0 %v484_v43  ;;  %v5179_v42 = vld [vmem:[#allocation5 + $0x6c0] ss:$8 sps:$4 sm:$0xff]   ;;  %v5187_v43 = vld [vmem:[#allocation5 + $0x6d4] ss:$8 sps:$4 sm:$0xff]  }
 0x14a   :  { %3059 = vmatprep.subr.bf16.mxu0 %v5115_v44  ;;  %2883 = vmatpush1.bf16.msra.mxu1 %v5188_v60  ;;  %v5240_v44 = vld [vmem:[#allocation5 + $0x270] ss:$8 sps:$4 sm:$0xff]  }
 0x14b   :  { %2893 = vmatprep.subr.bf16.mxu1 %v5196_v61  ;;  %v5215_v61 = vld [vmem:[#allocation5 + $0x714] ss:$8 sps:$4 sm:$0xff]  }
 0x14d   :  { %3060 = vmatpush1.bf16.msra.mxu0 %v5113_v47  ;;  %2885 = vmatmul.mubr.bf16.vlgmr.msra.gmra.mrb[0].mxu1 %v473_v0  ;;  %v5193_v47 = vld [vmem:[#allocation5 + $0x6e4] ss:$8 sps:$4 sm:$0xff]   ;;  %v5213_v0 = vld [vmem:[#allocation5 + $0x710] ss:$8 sps:$4 sm:$0xff]  }
 0x14e   :  { %3061 = vmatprep.subr.bf16.mxu0 %v5121_v48  ;;  %2894 = vmatpush1.bf16.msra.mxu1 %v5194_v1  ;;  %v5246_v48 = vld [vmem:[#allocation5 + $0x280] ss:$8 sps:$4 sm:$0xff]   ;;  %v5221_v1 = vld [vmem:[#allocation5 + $0x724] ss:$8 sps:$4 sm:$0xff]  }
 0x14f   :  { %2895 = vmatprep.subr.bf16.mxu1 %v5202_v2  ;;  %2925 = vmatprep.mubr.bf16.mxu1 %v476_v24  ;;  %v5270_v2 = vld [vmem:[#allocation5 + $0x2c0] ss:$8 sps:$4 sm:$0xff]   ;;  %v5239_v24 = vld [vmem:[#allocation5 + $0x754] ss:$8 sps:$4 sm:$0xff]  }
 0x151   :  { %3062 = vmatpush1.bf16.msra.mxu0 %v5119_v50  ;;  %v5199_v50 = vld [vmem:[#allocation5 + $0x6f4] ss:$8 sps:$4 sm:$0xff]  }
 0x152   :  { %3063 = vmatprep.subr.bf16.mxu0 %v5127_v51  ;;  %2896 = vmatpush1.bf16.msra.mxu1 %v5200_v6  ;;  %v5252_v51 = vld [vmem:[#allocation5 + $0x290] ss:$8 sps:$4 sm:$0xff]   ;;  %v5396_v6 = vld [vmem:[#allocation2 + $0xc] ss:$48 sps:$4 sm:$0xff]  }
 0x153   :  { %2897 = vmatprep.subr.bf16.mxu1 %v5212_v8  ;;  %v5397_v8 = vld [vmem:[#allocation2 + $0x6c] ss:$48 sps:$4 sm:$0xff]   ;;  %v284_v33 = vrot.slane %v5396_v6, %v6237_v23  ;;  %v5354_v6 = vld [vmem:[#allocation5 + $0x390] ss:$8 sps:$4 sm:$0xff]  }
 0x155   :  { %3064 = vmatpush1.bf16.msra.mxu0 %v5125_v54  ;;  %v374_v54 = vcombine.high %v356_v25, %v370_v26  ;;  %v299_v25 = vcombine.low %v6276_v12, %v6279_v14  ;;  %v5251_v12 = vld [vmem:[#allocation5 + $0x774] ss:$8 sps:$4 sm:$0xff]   ;;  %v5304_v14 = vld [vmem:[#allocation5 + $0x310] ss:$8 sps:$4 sm:$0xff]  }
 0x156   :  { %3065 = vmatprep.subr.bf16.mxu0 %v5133_v55  ;;  %2898 = vmatpush1.bf16.msra.mxu1 %v5210_v9  ;;  %v5209_v55 = vld [vmem:[#allocation5 + $0x704] ss:$8 sps:$4 sm:$0xff]  }
 0x157   :  { %2899 = vmatprep.subr.bf16.mxu1 %v5218_v11  ;;  %v486_v60 = vpack.c.bf16 %v374_v54, %v374_v54  ;;  %v5233_v9 = vld [vmem:[#allocation5 + $0x744] ss:$8 sps:$4 sm:$0xff]   ;;  %v298_v11 = vrot.slane %v5397_v8, %v6237_v23  ;;  %v5275_v54 = vld [vmem:[#allocation5 + $0x7b4] ss:$8 sps:$4 sm:$0xff]   ;;  %v5301_v8 = vld [vmem:[#allocation5 + $0x7f0] ss:$8 sps:$4 sm:$0xff]  }
 0x159   :  { %3066 = vmatpush1.bf16.msra.mxu0 %v5131_v58  ;;  %v5266_v58 = vld [vmem:[#allocation5 + $0x2b4] ss:$8 sps:$4 sm:$0xff]   ;;  %v6291_v18 = vcombine.low %v284_v33, %v298_v11 }
 0x15a   :  { %3067 = vmatprep.subr.bf16.mxu0 %v5139_v59  ;;  %2900 = vmatpush1.bf16.msra.mxu1 %v5216_v16  ;;  %v5207_v59 = vld [vmem:[#allocation5 + $0x700] ss:$8 sps:$4 sm:$0xff]  }
 0x15b   :  { %2901 = vmatprep.subr.bf16.mxu1 %v5224_v21  ;;  %v5282_v16 = vld [vmem:[#allocation5 + $0x2e0] ss:$8 sps:$4 sm:$0xff]  }
 0x15d   :  { %3068 = vmatpush1.bf16.msra.mxu0 %v5137_v62  ;;  %v5264_v62 = vld [vmem:[#allocation5 + $0x2b0] ss:$8 sps:$4 sm:$0xff]  }
 0x15e   :  { %3069 = vmatprep.subr.bf16.mxu0 %v5145_v63  ;;  %2902 = vmatpush1.bf16.msra.mxu1 %v5222_v28  ;;  %v5272_v63 = vld [vmem:[#allocation5 + $0x2c4] ss:$8 sps:$4 sm:$0xff]   ;;  %v5288_v28 = vld [vmem:[#allocation5 + $0x2f0] ss:$8 sps:$4 sm:$0xff]  }
 0x15f   :  { %2903 = vmatprep.subr.bf16.mxu1 %v5230_v30  ;;  %v302_v30 = vcombine.high %v284_v33, %v298_v11  ;;  %v5311_v33 = vld [vmem:[#allocation5 + $0x804] ss:$8 sps:$4 sm:$0xff]   ;;  %v5360_v11 = vld [vmem:[#allocation5 + $0x3a0] ss:$8 sps:$4 sm:$0xff]  }
 0x161   :  { %3070 = vmatpush1.bf16.msra.mxu0 %v5143_v3  ;;  %v5219_v3 = vld [vmem:[#allocation5 + $0x720] ss:$8 sps:$4 sm:$0xff]  }
 0x162   :  { %3071 = vmatprep.subr.bf16.mxu0 %v5151_v4  ;;  %2904 = vmatpush1.bf16.msra.mxu1 %v5228_v35  ;;  %v5227_v4 = vld [vmem:[#allocation5 + $0x734] ss:$8 sps:$4 sm:$0xff]   ;;  %v5298_v35 = vld [vmem:[#allocation5 + $0x300] ss:$8 sps:$4 sm:$0xff]  }
 0x163   :  { %2905 = vmatprep.subr.bf16.mxu1 %v5236_v36  ;;  %v475_v36 = vpack.c.bf16 %v299_v25, %v299_v25  ;;  %v5317_v25 = vld [vmem:[#allocation5 + $0x814] ss:$8 sps:$4 sm:$0xff]  }
 0x165   :  { %3072 = vmatpush1.bf16.msra.mxu0 %v5149_v5  ;;  %v5276_v5 = vld [vmem:[#allocation5 + $0x2d0] ss:$8 sps:$4 sm:$0xff]  }
 0x166   :  { %3073 = vmatprep.subr.bf16.mxu0 %v5157_v7  ;;  %2906 = vmatpush1.bf16.msra.mxu1 %v5234_v40  ;;  %v5225_v7 = vld [vmem:[#allocation5 + $0x730] ss:$8 sps:$4 sm:$0xff]   ;;  %v478_v40 = vpack.c.bf16 %v302_v30, %v302_v30 }
 0x167   :  { %2907 = vmatprep.subr.bf16.mxu1 %v5242_v41  ;;  %v5314_v41 = vld [vmem:[#allocation5 + $0x324] ss:$8 sps:$4 sm:$0xff]   ;;  %v5315_v30 = vld [vmem:[#allocation5 + $0x810] ss:$8 sps:$4 sm:$0xff]  }
 0x169   :  { %3074 = vmatpush1.bf16.msra.mxu0 %v5155_v13  ;;  %v5401_v13 = vld [vmem:[#allocation2 + $0x20] ss:$48 sps:$4 sm:$0xff]  }
 0x16a   :  { %3075 = vmatprep.subr.bf16.mxu0 %v5163_v15  ;;  %2908 = vmatpush1.bf16.msra.mxu1 %v5240_v44  ;;  %v5403_v15 = vld [vmem:[#allocation2 + $0x80] ss:$48 sps:$4 sm:$0xff]   ;;  %v6294_v20 = vrot.slane %v5401_v13, %v6237_v23 }
 0x16b   :  { %2909 = vmatprep.subr.bf16.mxu1 %v5248_v45  ;;  %v6297_v21 = vrot.slane %v5403_v15, %v6237_v23  ;;  %v5312_v44 = vld [vmem:[#allocation5 + $0x320] ss:$8 sps:$4 sm:$0xff]   ;;  %v5320_v45 = vld [vmem:[#allocation5 + $0x334] ss:$8 sps:$4 sm:$0xff]  }
 0x16c   :  { %v5368_v15 = vld [vmem:[#allocation5 + $0x3b4] ss:$8 sps:$4 sm:$0xff]  }
 0x16d   :  { %3076 = vmatpush1.bf16.msra.mxu0 %v5161_v22  ;;  %v5231_v22 = vld [vmem:[#allocation5 + $0x740] ss:$8 sps:$4 sm:$0xff]   ;;  %v6303_v26 = vcombine.low %v6294_v20, %v6297_v21  ;;  %v408_v13 = vcombine.high %v6294_v20, %v6297_v21  ;;  %v5374_v21 = vld [vmem:[#allocation5 + $0x3c4] ss:$8 sps:$4 sm:$0xff]  }
 0x16e   :  { %3077 = vmatprep.subr.bf16.mxu0 %v5169_v27  ;;  %2910 = vmatpush1.bf16.msra.mxu1 %v5246_v48  ;;  %v5237_v27 = vld [vmem:[#allocation5 + $0x750] ss:$8 sps:$4 sm:$0xff]  }
 0x16f   :  { %2911 = vmatprep.subr.bf16.mxu1 %v5254_v49  ;;  %v5318_v48 = vld [vmem:[#allocation5 + $0x330] ss:$8 sps:$4 sm:$0xff]   ;;  %v5326_v49 = vld [vmem:[#allocation5 + $0x344] ss:$8 sps:$4 sm:$0xff]  }
 0x171   :  { %3078 = vmatpush1.bf16.msra.mxu0 %v5167_v32  ;;  %v5300_v32 = vld [vmem:[#allocation5 + $0x304] ss:$8 sps:$4 sm:$0xff]  }
 0x172   :  { %3079 = vmatprep.subr.bf16.mxu0 %v5175_v34  ;;  %2912 = vmatpush1.bf16.msra.mxu1 %v5252_v51  ;;  %v5245_v34 = vld [vmem:[#allocation5 + $0x764] ss:$8 sps:$4 sm:$0xff]   ;;  %v5324_v51 = vld [vmem:[#allocation5 + $0x340] ss:$8 sps:$4 sm:$0xff]  }
 0x173   :  { %2913 = vmatprep.subr.bf16.mxu1 %v5260_v52  ;;  %v5332_v52 = vld [vmem:[#allocation5 + $0x354] ss:$8 sps:$4 sm:$0xff]  }
 0x175   :  { %3080 = vmatpush1.bf16.msra.mxu0 %v5173_v37  ;;  %v5306_v37 = vld [vmem:[#allocation5 + $0x314] ss:$8 sps:$4 sm:$0xff]  }
 0x176   :  { %3081 = vmatprep.subr.bf16.mxu0 %v5181_v38  ;;  %2914 = vmatpush1.bf16.msra.mxu1 %v5258_v56  ;;  %v5243_v38 = vld [vmem:[#allocation5 + $0x760] ss:$8 sps:$4 sm:$0xff]   ;;  %v5338_v56 = vld [vmem:[#allocation5 + $0x364] ss:$8 sps:$4 sm:$0xff]  }
 0x177   :  { %2915 = vmatprep.subr.bf16.mxu1 %v5266_v58  ;;  %v5281_v58 = vld [vmem:[#allocation5 + $0x7c4] ss:$8 sps:$4 sm:$0xff]  }
 0x179   :  { %3082 = vmatpush1.bf16.msra.mxu0 %v5179_v42  ;;  %v5249_v42 = vld [vmem:[#allocation5 + $0x770] ss:$8 sps:$4 sm:$0xff]  }
 0x17a   :  { %3083 = vmatprep.subr.bf16.mxu0 %v5187_v43  ;;  %2916 = vmatpush1.bf16.msra.mxu1 %v5264_v62  ;;  %v5257_v43 = vld [vmem:[#allocation5 + $0x784] ss:$8 sps:$4 sm:$0xff]   ;;  %v5287_v62 = vld [vmem:[#allocation5 + $0x7d4] ss:$8 sps:$4 sm:$0xff]  }
 0x17b   :  { %2917 = vmatprep.subr.bf16.mxu1 %v5272_v63  ;;  %v5342_v63 = vld [vmem:[#allocation5 + $0x370] ss:$8 sps:$4 sm:$0xff]  }
 0x17d   :  { %3084 = vmatpush1.bf16.msra.mxu0 %v5185_v46  ;;  %v5255_v46 = vld [vmem:[#allocation5 + $0x780] ss:$8 sps:$4 sm:$0xff]  }
 0x17e   :  { %3085 = vmatprep.subr.bf16.mxu0 %v5193_v47  ;;  %2918 = vmatpush1.bf16.msra.mxu1 %v5270_v2  ;;  %v5263_v47 = vld [vmem:[#allocation5 + $0x794] ss:$8 sps:$4 sm:$0xff]   ;;  %v5293_v2 = vld [vmem:[#allocation5 + $0x7e4] ss:$8 sps:$4 sm:$0xff]  }
 0x17f   :  { %2919 = vmatprep.subr.bf16.mxu1 %v5278_v31  ;;  %v5348_v31 = vld [vmem:[#allocation5 + $0x380] ss:$8 sps:$4 sm:$0xff]  }
 0x181   :  { %3086 = vmatpush1.bf16.msra.mxu0 %v5191_v39  ;;  %v5261_v39 = vld [vmem:[#allocation5 + $0x790] ss:$8 sps:$4 sm:$0xff]  }
 0x182   :  { %3087 = vmatprep.subr.bf16.mxu0 %v5199_v50  ;;  %2920 = vmatpush1.bf16.msra.mxu1 %v5276_v5  ;;  %v5269_v50 = vld [vmem:[#allocation5 + $0x7a4] ss:$8 sps:$4 sm:$0xff]   ;;  %v5303_v5 = vld [vmem:[#allocation5 + $0x7f4] ss:$8 sps:$4 sm:$0xff]  }
 0x183   :  { %2921 = vmatprep.subr.bf16.mxu1 %v5284_v10  ;;  %v5454_v10 = vld [vmem:[#allocation2 + $0x84] ss:$48 sps:$4 sm:$0xff]  }
 0x185   :  { %3088 = vmatpush1.bf16.msra.mxu0 %v5197_v53  ;;  %v5267_v53 = vld [vmem:[#allocation5 + $0x7a0] ss:$8 sps:$4 sm:$0xff]  }
 0x186   :  { %3098 = vmatprep.subr.bf16.mxu0 %v5209_v55  ;;  %2922 = vmatpush1.bf16.msra.mxu1 %v5282_v16  ;;  %v5330_v55 = vld [vmem:[#allocation5 + $0x350] ss:$8 sps:$4 sm:$0xff]  }
 0x187   :  { %2923 = vmatprep.subr.bf16.mxu1 %v5290_v19  ;;  %v6311_v19 = vrot.slane %v5454_v10, %v6237_v23  ;;  %v5410_v10 = vld [vmem:[#allocation5 + $0x914] ss:$8 sps:$4 sm:$0xff]  }
 0x188   :  { %3090 = vmatmul.mubr.bf16.vlgmr.msra.gmra.mrb[0].mxu0 %v483_v57  ;;  %v5273_v57 = vld [vmem:[#allocation5 + $0x7b0] ss:$8 sps:$4 sm:$0xff]  }
 0x189   :  { %3099 = vmatpush1.bf16.msra.mxu0 %v5207_v59  ;;  %3130 = vmatprep.mubr.bf16.mxu0 %v486_v60  ;;  %v5336_v59 = vld [vmem:[#allocation5 + $0x360] ss:$8 sps:$4 sm:$0xff]   ;;  %v5344_v60 = vld [vmem:[#allocation5 + $0x374] ss:$8 sps:$4 sm:$0xff]  }
 0x18a   :  { %3100 = vmatprep.subr.bf16.mxu0 %v5215_v61  ;;  %2924 = vmatpush1.bf16.msra.mxu1 %v5288_v28  ;;  %v5279_v61 = vld [vmem:[#allocation5 + $0x7c0] ss:$8 sps:$4 sm:$0xff]   ;;  %v488_v28 = vpack.c.bf16 %v408_v13, %v408_v13 }
 0x18b   :  { %2934 = vmatprep.subr.bf16.mxu1 %v5300_v32  ;;  %v5323_v32 = vld [vmem:[#allocation5 + $0x824] ss:$8 sps:$4 sm:$0xff]   ;;  %v5411_v13 = vld [vmem:[#allocation5 + $0x920] ss:$8 sps:$4 sm:$0xff]  }
 0x18d   :  { %3101 = vmatpush1.bf16.msra.mxu0 %v5213_v0  ;;  %2926 = vmatmul.mubr.bf16.vlgmr.msra.gmra.mrb[0].mxu1 %v475_v36  ;;  %v5350_v0 = vld [vmem:[#allocation5 + $0x384] ss:$8 sps:$4 sm:$0xff]   ;;  %v5329_v36 = vld [vmem:[#allocation5 + $0x834] ss:$8 sps:$4 sm:$0xff]  }
 0x18e   :  { %3102 = vmatprep.subr.bf16.mxu0 %v5221_v1  ;;  %2935 = vmatpush1.bf16.msra.mxu1 %v5298_v35  ;;  %v5285_v1 = vld [vmem:[#allocation5 + $0x7d0] ss:$8 sps:$4 sm:$0xff]   ;;  %v5321_v35 = vld [vmem:[#allocation5 + $0x820] ss:$8 sps:$4 sm:$0xff]  }
 0x18f   :  { %2966 = vmatprep.mubr.bf16.mxu1 %v478_v40  ;;  %2936 = vmatprep.subr.bf16.mxu1 %v5306_v37  ;;  %v5378_v37 = vld [vmem:[#allocation5 + $0x3d0] ss:$8 sps:$4 sm:$0xff]  }
 0x190   :  { %v5327_v40 = vld [vmem:[#allocation5 + $0x830] ss:$8 sps:$4 sm:$0xff]  }
 0x191   :  { %3103 = vmatpush1.bf16.msra.mxu0 %v5219_v3  ;;  %v5356_v3 = vld [vmem:[#allocation5 + $0x394] ss:$8 sps:$4 sm:$0xff]  }
 0x192   :  { %3104 = vmatprep.subr.bf16.mxu0 %v5227_v4  ;;  %2937 = vmatpush1.bf16.msra.mxu1 %v5304_v14  ;;  %v5291_v4 = vld [vmem:[#allocation5 + $0x7e0] ss:$8 sps:$4 sm:$0xff]  }
 0x193   :  { %2938 = vmatprep.subr.bf16.mxu1 %v5314_v41  ;;  %v5384_v14 = vld [vmem:[#allocation5 + $0x3e0] ss:$8 sps:$4 sm:$0xff]   ;;  %v5392_v41 = vld [vmem:[#allocation5 + $0x3f4] ss:$8 sps:$4 sm:$0xff]  }
 0x195   :  { %3105 = vmatpush1.bf16.msra.mxu0 %v5225_v7  ;;  %v5362_v7 = vld [vmem:[#allocation5 + $0x3a4] ss:$8 sps:$4 sm:$0xff]  }
 0x196   :  { %3106 = vmatprep.subr.bf16.mxu0 %v5233_v9  ;;  %2939 = vmatpush1.bf16.msra.mxu1 %v5312_v44  ;;  %v5453_v9 = vld [vmem:[#allocation2 + $0x24] ss:$48 sps:$4 sm:$0xff]   ;;  %v5390_v44 = vld [vmem:[#allocation5 + $0x3f0] ss:$8 sps:$4 sm:$0xff]  }
 0x197   :  { %2940 = vmatprep.subr.bf16.mxu1 %v5320_v45  ;;  %v6308_v16 = vrot.slane %v5453_v9, %v6237_v23  ;;  %v5339_v45 = vld [vmem:[#allocation5 + $0x850] ss:$8 sps:$4 sm:$0xff]  }
 0x199   :  { %3107 = vmatpush1.bf16.msra.mxu0 %v5231_v22  ;;  %v5309_v22 = vld [vmem:[#allocation5 + $0x800] ss:$8 sps:$4 sm:$0xff]   ;;  %v6317_v20 = vcombine.low %v6308_v16, %v6311_v19 }
 0x19a   :  { %3108 = vmatprep.subr.bf16.mxu0 %v5239_v24  ;;  %2941 = vmatpush1.bf16.msra.mxu1 %v5318_v48  ;;  %v485_v24 = vpack.c.bf16 %v6285_v29, %v6285_v29  ;;  %v5380_v29 = vld [vmem:[#allocation5 + $0x3d4] ss:$8 sps:$4 sm:$0xff]   ;;  %v5345_v48 = vld [vmem:[#allocation5 + $0x860] ss:$8 sps:$4 sm:$0xff]  }
 0x19b   :  { %2942 = vmatprep.subr.bf16.mxu1 %v5326_v49  ;;  %v5353_v49 = vld [vmem:[#allocation5 + $0x874] ss:$8 sps:$4 sm:$0xff]  }
 0x19d   :  { %3109 = vmatpush1.bf16.msra.mxu0 %v5237_v27  ;;  %v5366_v27 = vld [vmem:[#allocation5 + $0x3b0] ss:$8 sps:$4 sm:$0xff]  }
 0x19e   :  { %3110 = vmatprep.subr.bf16.mxu0 %v5245_v34  ;;  %2943 = vmatpush1.bf16.msra.mxu1 %v5324_v51  ;;  %v5372_v34 = vld [vmem:[#allocation5 + $0x3c0] ss:$8 sps:$4 sm:$0xff]  }
 0x19f   :  { %2944 = vmatprep.subr.bf16.mxu1 %v5332_v52  ;;  %v5357_v51 = vld [vmem:[#allocation5 + $0x880] ss:$8 sps:$4 sm:$0xff]   ;;  %v5365_v52 = vld [vmem:[#allocation5 + $0x894] ss:$8 sps:$4 sm:$0xff]  }
 0x1a1   :  { %3111 = vmatpush1.bf16.msra.mxu0 %v5243_v38  ;;  %v5386_v38 = vld [vmem:[#allocation5 + $0x3e4] ss:$8 sps:$4 sm:$0xff]  }
 0x1a2   :  { %3112 = vmatprep.subr.bf16.mxu0 %v5251_v12  ;;  %2945 = vmatpush1.bf16.msra.mxu1 %v5330_v55  ;;  %v5335_v12 = vld [vmem:[#allocation5 + $0x844] ss:$8 sps:$4 sm:$0xff]   ;;  %v5377_v55 = vld [vmem:[#allocation5 + $0x8b4] ss:$8 sps:$4 sm:$0xff]  }
 0x1a3   :  { %2946 = vmatprep.subr.bf16.mxu1 %v5338_v56  ;;  %v5375_v56 = vld [vmem:[#allocation5 + $0x8b0] ss:$8 sps:$4 sm:$0xff]  }
 0x1a5   :  { %3113 = vmatpush1.bf16.msra.mxu0 %v5249_v42  ;;  %v5333_v42 = vld [vmem:[#allocation5 + $0x840] ss:$8 sps:$4 sm:$0xff]  }
 0x1a6   :  { %3114 = vmatprep.subr.bf16.mxu0 %v5257_v43  ;;  %2947 = vmatpush1.bf16.msra.mxu1 %v5336_v59  ;;  %v5341_v43 = vld [vmem:[#allocation5 + $0x854] ss:$8 sps:$4 sm:$0xff]  }
 0x1a7   :  { %2948 = vmatprep.subr.bf16.mxu1 %v5344_v60  ;;  %v5389_v59 = vld [vmem:[#allocation5 + $0x8d4] ss:$8 sps:$4 sm:$0xff]   ;;  %v5387_v60 = vld [vmem:[#allocation5 + $0x8d0] ss:$8 sps:$4 sm:$0xff]  }
 0x1a9   :  { %3115 = vmatpush1.bf16.msra.mxu0 %v5255_v46  ;;  %v5347_v46 = vld [vmem:[#allocation5 + $0x864] ss:$8 sps:$4 sm:$0xff]  }
 0x1aa   :  { %3116 = vmatprep.subr.bf16.mxu0 %v5263_v47  ;;  %2949 = vmatpush1.bf16.msra.mxu1 %v5342_v63  ;;  %v477_v47 = vpack.c.bf16 %v6291_v18, %v6291_v18  ;;  %v5369_v18 = vld [vmem:[#allocation5 + $0x8a0] ss:$8 sps:$4 sm:$0xff]   ;;  %v5400_v63 = vld [vmem:[#allocation5 + $0x8f4] ss:$8 sps:$4 sm:$0xff]  }
 0x1ab   :  { %2950 = vmatprep.subr.bf16.mxu1 %v5350_v0  ;;  %v5503_v0 = vld [vmem:[#allocation2 + $0x28] ss:$48 sps:$4 sm:$0xff]  }
 0x1ad   :  { %3117 = vmatpush1.bf16.msra.mxu0 %v5261_v39  ;;  %v5351_v39 = vld [vmem:[#allocation5 + $0x870] ss:$8 sps:$4 sm:$0xff]  }
 0x1ae   :  { %3118 = vmatprep.subr.bf16.mxu0 %v5269_v50  ;;  %2951 = vmatpush1.bf16.msra.mxu1 %v5348_v31  ;;  %v5359_v50 = vld [vmem:[#allocation5 + $0x884] ss:$8 sps:$4 sm:$0xff]   ;;  %v410_v31 = vcombine.high %v6308_v16, %v6311_v19  ;;  %v5417_v19 = vld [vmem:[#allocation5 + $0x940] ss:$8 sps:$4 sm:$0xff]  }
 0x1af   :  { %2952 = vmatprep.subr.bf16.mxu1 %v5356_v3  ;;  %v5407_v3 = vld [vmem:[#allocation5 + $0x904] ss:$8 sps:$4 sm:$0xff]  }
 0x1b0   :  { %v5419_v16 = vld [vmem:[#allocation5 + $0x944] ss:$8 sps:$4 sm:$0xff]  }
 0x1b1   :  { %3119 = vmatpush1.bf16.msra.mxu0 %v5267_v53  ;;  %v5363_v53 = vld [vmem:[#allocation5 + $0x890] ss:$8 sps:$4 sm:$0xff]  }
 0x1b2   :  { %3120 = vmatprep.subr.bf16.mxu0 %v5275_v54  ;;  %2953 = vmatpush1.bf16.msra.mxu1 %v5354_v6  ;;  %v5371_v54 = vld [vmem:[#allocation5 + $0x8a4] ss:$8 sps:$4 sm:$0xff]   ;;  %v487_v6 = vpack.c.bf16 %v6303_v26, %v6303_v26  ;;  %v5414_v26 = vld [vmem:[#allocation5 + $0x930] ss:$8 sps:$4 sm:$0xff]  }
 0x1b3   :  { %2954 = vmatprep.subr.bf16.mxu1 %v5362_v7  ;;  %v5405_v7 = vld [vmem:[#allocation5 + $0x900] ss:$8 sps:$4 sm:$0xff]  }
 0x1b5   :  { %3121 = vmatpush1.bf16.msra.mxu0 %v5273_v57  ;;  %v5383_v57 = vld [vmem:[#allocation5 + $0x8c4] ss:$8 sps:$4 sm:$0xff]  }
 0x1b6   :  { %3122 = vmatprep.subr.bf16.mxu0 %v5281_v58  ;;  %2955 = vmatpush1.bf16.msra.mxu1 %v5360_v11  ;;  %v5381_v58 = vld [vmem:[#allocation5 + $0x8c0] ss:$8 sps:$4 sm:$0xff]   ;;  %v5413_v11 = vld [vmem:[#allocation5 + $0x924] ss:$8 sps:$4 sm:$0xff]  }
 0x1b7   :  { %2956 = vmatprep.subr.bf16.mxu1 %v5368_v15  ;;  %v5416_v15 = vld [vmem:[#allocation5 + $0x934] ss:$8 sps:$4 sm:$0xff]  }
 0x1b9   :  { %3123 = vmatpush1.bf16.msra.mxu0 %v5279_v61  ;;  %v5395_v61 = vld [vmem:[#allocation5 + $0x8e4] ss:$8 sps:$4 sm:$0xff]  }
 0x1ba   :  { %3124 = vmatprep.subr.bf16.mxu0 %v5287_v62  ;;  %2957 = vmatpush1.bf16.msra.mxu1 %v5366_v27  ;;  %v5393_v62 = vld [vmem:[#allocation5 + $0x8e0] ss:$8 sps:$4 sm:$0xff]  }
 0x1bb   :  { %2958 = vmatprep.subr.bf16.mxu1 %v5374_v21  ;;  %v5423_v27 = vld [vmem:[#allocation5 + $0x960] ss:$8 sps:$4 sm:$0xff]   ;;  %v5426_v21 = vld [vmem:[#allocation5 + $0x970] ss:$8 sps:$4 sm:$0xff]  }
 0x1bd   :  { %3125 = vmatpush1.bf16.msra.mxu0 %v5285_v1  ;;  %v5505_v1 = vld [vmem:[#allocation2 + $0x88] ss:$48 sps:$4 sm:$0xff]  }
 0x1be   :  { %3126 = vmatprep.subr.bf16.mxu0 %v5293_v2  ;;  %2959 = vmatpush1.bf16.msra.mxu1 %v5372_v34  ;;  %v5398_v2 = vld [vmem:[#allocation5 + $0x8f0] ss:$8 sps:$4 sm:$0xff]   ;;  %v5434_v34 = vld [vmem:[#allocation5 + $0x994] ss:$8 sps:$4 sm:$0xff]  }
 0x1bf   :  { %2960 = vmatprep.subr.bf16.mxu1 %v5380_v29  ;;  %v5432_v29 = vld [vmem:[#allocation5 + $0x990] ss:$8 sps:$4 sm:$0xff]  }
 0x1c1   :  { %3127 = vmatpush1.bf16.msra.mxu0 %v5291_v4  ;;  %v6324_v4 = vrot.slane %v5503_v0, %v6237_v23  ;;  %v5568_v0 = vld [vmem:[#allocation8 + $0x34] ss:$8 sps:$4 sm:$0xff]  }
 0x1c2   :  { %3128 = vmatprep.subr.bf16.mxu0 %v5303_v5  ;;  %2961 = vmatpush1.bf16.msra.mxu1 %v5378_v37  ;;  %v6327_v5 = vrot.slane %v5505_v1, %v6237_v23  ;;  %v5440_v37 = vld [vmem:[#allocation5 + $0x9b4] ss:$8 sps:$4 sm:$0xff]   ;;  %v5469_v1 = vld [vmem:[#allocation5 + $0xa44] ss:$8 sps:$4 sm:$0xff]  }
 0x1c3   :  { %2962 = vmatprep.subr.bf16.mxu1 %v5386_v38  ;;  %v5438_v38 = vld [vmem:[#allocation5 + $0x9b0] ss:$8 sps:$4 sm:$0xff]  }
 0x1c4   :  { %v6333_v9 = vcombine.low %v6324_v4, %v6327_v5 }
 0x1c5   :  { %3129 = vmatpush1.bf16.msra.mxu0 %v5301_v8  ;;  %v490_v8 = vpack.c.bf16 %v410_v31, %v410_v31  ;;  %v5467_v31 = vld [vmem:[#allocation5 + $0xa40] ss:$8 sps:$4 sm:$0xff]  }
 0x1c6   :  { %3139 = vmatprep.subr.bf16.mxu0 %v5311_v33  ;;  %2963 = vmatpush1.bf16.msra.mxu1 %v5384_v14  ;;  %v5408_v33 = vld [vmem:[#allocation5 + $0x910] ss:$8 sps:$4 sm:$0xff]   ;;  %v5446_v14 = vld [vmem:[#allocation5 + $0x9d4] ss:$8 sps:$4 sm:$0xff]  }
 0x1c7   :  { %2964 = vmatprep.subr.bf16.mxu1 %v5392_v41  ;;  %v5444_v41 = vld [vmem:[#allocation5 + $0x9d0] ss:$8 sps:$4 sm:$0xff]  }
 0x1c8   :  { %3131 = vmatmul.mubr.bf16.vlgmr.msra.gmra.mrb[0].mxu0 %v485_v24  ;;  %v5420_v24 = vld [vmem:[#allocation5 + $0x950] ss:$8 sps:$4 sm:$0xff]  }
 0x1c9   :  { %3140 = vmatpush1.bf16.msra.mxu0 %v5309_v22  ;;  %3171 = vmatprep.mubr.bf16.mxu0 %v488_v28  ;;  %v5422_v22 = vld [vmem:[#allocation5 + $0x954] ss:$8 sps:$4 sm:$0xff]  }
 0x1ca   :  { %3141 = vmatprep.subr.bf16.mxu0 %v5317_v25  ;;  %2965 = vmatpush1.bf16.msra.mxu1 %v5390_v44  ;;  %v5425_v25 = vld [vmem:[#allocation5 + $0x964] ss:$8 sps:$4 sm:$0xff]   ;;  %v5428_v28 = vld [vmem:[#allocation5 + $0x974] ss:$8 sps:$4 sm:$0xff]  }
 0x1cb   :  { %v5452_v44 = vld [vmem:[#allocation5 + $0x9f4] ss:$8 sps:$4 sm:$0xff]  }
 0x1cd   :  { %3142 = vmatpush1.bf16.msra.mxu0 %v5315_v30  ;;  %2967 = vmatmul.mubr.bf16.vlgmr.msra.gmra.mrb[0].mxu1 %v477_v47  ;;  %v5431_v30 = vld [vmem:[#allocation5 + $0x984] ss:$8 sps:$4 sm:$0xff]   ;;  %v5450_v47 = vld [vmem:[#allocation5 + $0x9f0] ss:$8 sps:$4 sm:$0xff]  }
 0x1ce   :  { %3143 = vmatprep.subr.bf16.mxu0 %v5323_v32  ;;  %v5429_v32 = vld [vmem:[#allocation5 + $0x980] ss:$8 sps:$4 sm:$0xff]  }
 0x1d1   :  { %3144 = vmatpush1.bf16.msra.mxu0 %v5321_v35  ;;  %v5437_v35 = vld [vmem:[#allocation5 + $0x9a4] ss:$8 sps:$4 sm:$0xff]  }
 0x1d2   :  { %3145 = vmatprep.subr.bf16.mxu0 %v5329_v36  ;;  %v5435_v36 = vld [vmem:[#allocation5 + $0x9a0] ss:$8 sps:$4 sm:$0xff]  }
 0x1d5   :  { %3146 = vmatpush1.bf16.msra.mxu0 %v5327_v40  ;;  %v5443_v40 = vld [vmem:[#allocation5 + $0x9c4] ss:$8 sps:$4 sm:$0xff]  }
 0x1d6   :  { %3147 = vmatprep.subr.bf16.mxu0 %v5335_v12  ;;  %v5441_v12 = vld [vmem:[#allocation5 + $0x9c0] ss:$8 sps:$4 sm:$0xff]  }
 0x1d9   :  { %3148 = vmatpush1.bf16.msra.mxu0 %v5333_v42  ;;  %v5449_v42 = vld [vmem:[#allocation5 + $0x9e4] ss:$8 sps:$4 sm:$0xff]  }
 0x1da   :  { %3149 = vmatprep.subr.bf16.mxu0 %v5341_v43  ;;  %v5447_v43 = vld [vmem:[#allocation5 + $0x9e0] ss:$8 sps:$4 sm:$0xff]  }
 0x1dd   :  { %3150 = vmatpush1.bf16.msra.mxu0 %v5339_v45  ;;  %v5555_v45 = vld [vmem:[#allocation2 + $0x2c] ss:$48 sps:$4 sm:$0xff]  }
 0x1de   :  { %3151 = vmatprep.subr.bf16.mxu0 %v5347_v46  ;;  %v5556_v46 = vld [vmem:[#allocation2 + $0x8c] ss:$48 sps:$4 sm:$0xff]  }
 0x1e1   :  { %3152 = vmatpush1.bf16.msra.mxu0 %v5345_v48  ;;  %v444_v48 = vcombine.high %v6324_v4, %v6327_v5  ;;  %v5472_v4 = vld [vmem:[#allocation5 + $0xa54] ss:$8 sps:$4 sm:$0xff]   ;;  %v5569_v5 = vld [vmem:[#allocation8 + $0x40] ss:$8 sps:$4 sm:$0xff]  }
 0x1e2   :  { %3153 = vmatprep.subr.bf16.mxu0 %v5353_v49  ;;  %v6338_v49 = vrot.slane %v5555_v45, %v6237_v23  ;;  %v5494_v45 = vld [vmem:[#allocation5 + $0xad0] ss:$8 sps:$4 sm:$0xff]  }
 0x1e5   :  { %3154 = vmatpush1.bf16.msra.mxu0 %v5351_v39  ;;  %v6341_v39 = vrot.slane %v5556_v46, %v6237_v23  ;;  %v5559_v23 = vld [vmem:[#allocation8 + $0x4] ss:$8 sps:$4 sm:$0xff]   ;;  %v5598_v46 = vld [vmem:[#allocation8 + $0xd4] ss:$8 sps:$4 sm:$0xff]  }
 0x1e6   :  { %3155 = vmatprep.subr.bf16.mxu0 %v5359_v50  ;;  %v5457_v50 = vld [vmem:[#allocation5 + $0xa04] ss:$8 sps:$4 sm:$0xff]   ;;  %3511 = vmatprep.subr.bf16.mxu1 %v5559_v23 }
 0x1e9   :  { %3156 = vmatpush1.bf16.msra.mxu0 %v5357_v51  ;;  %v489_v51 = vpack.c.bf16 %v6317_v20, %v6317_v20  ;;  %v5560_v20 = vld [vmem:[#allocation8 + $0x10] ss:$8 sps:$4 sm:$0xff]  }
 0x1ea   :  { %3157 = vmatprep.subr.bf16.mxu0 %v5365_v52  ;;  %v6347_v52 = vcombine.low %v6338_v49, %v6341_v39 }
 0x1ed   :  { %3158 = vmatpush1.bf16.msra.mxu0 %v5363_v53  ;;  %v5455_v53 = vld [vmem:[#allocation5 + $0xa00] ss:$8 sps:$4 sm:$0xff]  }
 0x1ee   :  { %3159 = vmatprep.subr.bf16.mxu0 %v5371_v54  ;;  %v492_v54 = vpack.c.bf16 %v444_v48, %v444_v48  ;;  %v5596_v48 = vld [vmem:[#allocation8 + $0xd0] ss:$8 sps:$4 sm:$0xff]  }
 0x1f1   :  { %3160 = vmatpush1.bf16.msra.mxu0 %v5369_v18  ;;  %v5460_v18 = vld [vmem:[#allocation5 + $0xa14] ss:$8 sps:$4 sm:$0xff]  }
 0x1f2   :  { %3161 = vmatprep.subr.bf16.mxu0 %v5377_v55  ;;  %v5557_v55 = vld [vmem:[#allocation8] ss:$8 sps:$4 sm:$0xff]  }
 0x1f3   :  { %3512 = vmatpush1.bf16.msra.mxu1 %v5557_v55  ;;  %v491_v55 = vpack.c.bf16 %v6333_v9, %v6333_v9  ;;  %v5519_v9 = vld [vmem:[#allocation5 + $0xb40] ss:$8 sps:$4 sm:$0xff]  }
 0x1f5   :  { %3162 = vmatpush1.bf16.msra.mxu0 %v5375_v56  ;;  %v5458_v56 = vld [vmem:[#allocation5 + $0xa10] ss:$8 sps:$4 sm:$0xff]  }
 0x1f6   :  { %3163 = vmatprep.subr.bf16.mxu0 %v5383_v57  ;;  %v5562_v57 = vld [vmem:[#allocation8 + $0x14] ss:$8 sps:$4 sm:$0xff]  }
 0x1f7   :  { %3513 = vmatprep.subr.bf16.mxu1 %v5562_v57  ;;  %v5512_v57 = vld [vmem:[#allocation5 + $0xb14] ss:$8 sps:$4 sm:$0xff]  }
 0x1f8   :  { %3514 = vmatpush1.bf16.msra.mxu1 %v5560_v20  ;;  %v5515_v20 = vld [vmem:[#allocation5 + $0xb24] ss:$8 sps:$4 sm:$0xff]  }
 0x1f9   :  { %3164 = vmatpush1.bf16.msra.mxu0 %v5381_v58  ;;  %v5463_v58 = vld [vmem:[#allocation5 + $0xa24] ss:$8 sps:$4 sm:$0xff]  }
 0x1fa   :  { %3165 = vmatprep.subr.bf16.mxu0 %v5389_v59  ;;  %v5461_v59 = vld [vmem:[#allocation5 + $0xa20] ss:$8 sps:$4 sm:$0xff]  }
 0x1fd   :  { %3166 = vmatpush1.bf16.msra.mxu0 %v5387_v60  ;;  %v5565_v60 = vld [vmem:[#allocation8 + $0x24] ss:$8 sps:$4 sm:$0xff]  }
 0x1fe   :  { %3167 = vmatprep.subr.bf16.mxu0 %v5395_v61  ;;  %v5466_v61 = vld [vmem:[#allocation5 + $0xa34] ss:$8 sps:$4 sm:$0xff]   ;;  %3515 = vmatprep.subr.bf16.mxu1 %v5565_v60  ;;  %v5521_v60 = vld [vmem:[#allocation5 + $0xb44] ss:$8 sps:$4 sm:$0xff]  }
 0x201   :  { %3168 = vmatpush1.bf16.msra.mxu0 %v5393_v62  ;;  %v5563_v62 = vld [vmem:[#allocation8 + $0x20] ss:$8 sps:$4 sm:$0xff]  }
 0x202   :  { %3169 = vmatprep.subr.bf16.mxu0 %v5400_v63  ;;  %v5464_v63 = vld [vmem:[#allocation5 + $0xa30] ss:$8 sps:$4 sm:$0xff]   ;;  %3516 = vmatpush1.bf16.msra.mxu1 %v5563_v62 }
 0x203   :  { %3517 = vmatprep.subr.bf16.mxu1 %v5568_v0  ;;  %v5522_v62 = vld [vmem:[#allocation5 + $0xb50] ss:$8 sps:$4 sm:$0xff]   ;;  %v5525_v0 = vld [vmem:[#allocation5 + $0xb60] ss:$8 sps:$4 sm:$0xff]  }
 0x205   :  { %3170 = vmatpush1.bf16.msra.mxu0 %v5398_v2  ;;  %v5566_v2 = vld [vmem:[#allocation8 + $0x30] ss:$8 sps:$4 sm:$0xff]  }
 0x206   :  { %3180 = vmatprep.subr.bf16.mxu0 %v5407_v3  ;;  %v5571_v3 = vld [vmem:[#allocation8 + $0x44] ss:$8 sps:$4 sm:$0xff]   ;;  %3518 = vmatpush1.bf16.msra.mxu1 %v5566_v2 }
 0x207   :  { %3519 = vmatprep.subr.bf16.mxu1 %v5571_v3  ;;  %v5528_v2 = vld [vmem:[#allocation5 + $0xb70] ss:$8 sps:$4 sm:$0xff]   ;;  %v5531_v3 = vld [vmem:[#allocation5 + $0xb80] ss:$8 sps:$4 sm:$0xff]  }
 0x208   :  { %3172 = vmatmul.mubr.bf16.vlgmr.msra.gmra.mrb[0].mxu0 %v487_v6  ;;  %v5470_v6 = vld [vmem:[#allocation5 + $0xa50] ss:$8 sps:$4 sm:$0xff]  }
 0x209   :  { %3181 = vmatpush1.bf16.msra.mxu0 %v5405_v7  ;;  %3212 = vmatprep.mubr.bf16.mxu0 %v490_v8  ;;  %v5574_v7 = vld [vmem:[#allocation8 + $0x54] ss:$8 sps:$4 sm:$0xff]   ;;  %v5475_v8 = vld [vmem:[#allocation5 + $0xa64] ss:$8 sps:$4 sm:$0xff]  }
 0x20a   :  { %3182 = vmatprep.subr.bf16.mxu0 %v5410_v10  ;;  %3520 = vmatpush1.bf16.msra.mxu1 %v5569_v5  ;;  %v5572_v10 = vld [vmem:[#allocation8 + $0x50] ss:$8 sps:$4 sm:$0xff]  }
 0x20b   :  { %3521 = vmatprep.subr.bf16.mxu1 %v5574_v7  ;;  %v5534_v5 = vld [vmem:[#allocation5 + $0xb90] ss:$8 sps:$4 sm:$0xff]   ;;  %v5537_v7 = vld [vmem:[#allocation5 + $0xba0] ss:$8 sps:$4 sm:$0xff]  }
 0x20d   :  { %3183 = vmatpush1.bf16.msra.mxu0 %v5408_v33  ;;  %v5473_v33 = vld [vmem:[#allocation5 + $0xa60] ss:$8 sps:$4 sm:$0xff]  }
 0x20e   :  { %3184 = vmatprep.subr.bf16.mxu0 %v5413_v11  ;;  %v5577_v11 = vld [vmem:[#allocation8 + $0x64] ss:$8 sps:$4 sm:$0xff]   ;;  %3522 = vmatpush1.bf16.msra.mxu1 %v5572_v10 }
 0x20f   :  { %3523 = vmatprep.subr.bf16.mxu1 %v5577_v11  ;;  %v5540_v10 = vld [vmem:[#allocation5 + $0xbb0] ss:$8 sps:$4 sm:$0xff]   ;;  %v5545_v11 = vld [vmem:[#allocation5 + $0xbc4] ss:$8 sps:$4 sm:$0xff]  }
 0x211   :  { %3185 = vmatpush1.bf16.msra.mxu0 %v5411_v13  ;;  %v5478_v13 = vld [vmem:[#allocation5 + $0xa74] ss:$8 sps:$4 sm:$0xff]  }
 0x212   :  { %3186 = vmatprep.subr.bf16.mxu0 %v5416_v15  ;;  %v5575_v15 = vld [vmem:[#allocation8 + $0x60] ss:$8 sps:$4 sm:$0xff]  }
 0x213   :  { %3524 = vmatpush1.bf16.msra.mxu1 %v5575_v15 }
 0x215   :  { %3187 = vmatpush1.bf16.msra.mxu0 %v5414_v26  ;;  %v5476_v26 = vld [vmem:[#allocation5 + $0xa70] ss:$8 sps:$4 sm:$0xff]  }
 0x216   :  { %3188 = vmatprep.subr.bf16.mxu0 %v5419_v16  ;;  %v5580_v16 = vld [vmem:[#allocation8 + $0x74] ss:$8 sps:$4 sm:$0xff]  }
 0x217   :  { %3525 = vmatprep.subr.bf16.mxu1 %v5580_v16  ;;  %v5543_v16 = vld [vmem:[#allocation5 + $0xbc0] ss:$8 sps:$4 sm:$0xff]  }
 0x219   :  { %3189 = vmatpush1.bf16.msra.mxu0 %v5417_v19  ;;  %v5481_v19 = vld [vmem:[#allocation5 + $0xa84] ss:$8 sps:$4 sm:$0xff]  }
 0x21a   :  { %3190 = vmatprep.subr.bf16.mxu0 %v5422_v22  ;;  %v5578_v22 = vld [vmem:[#allocation8 + $0x70] ss:$8 sps:$4 sm:$0xff]  }
 0x21b   :  { %3526 = vmatpush1.bf16.msra.mxu1 %v5578_v22  ;;  %v5546_v22 = vld [vmem:[#allocation5 + $0xbd0] ss:$8 sps:$4 sm:$0xff]  }
 0x21d   :  { %3191 = vmatpush1.bf16.msra.mxu0 %v5420_v24  ;;  %v5479_v24 = vld [vmem:[#allocation5 + $0xa80] ss:$8 sps:$4 sm:$0xff]  }
 0x21e   :  { %3192 = vmatprep.subr.bf16.mxu0 %v5425_v25  ;;  %v5583_v25 = vld [vmem:[#allocation8 + $0x84] ss:$8 sps:$4 sm:$0xff]  }
 0x21f   :  { %3527 = vmatprep.subr.bf16.mxu1 %v5583_v25  ;;  %v5549_v25 = vld [vmem:[#allocation5 + $0xbe0] ss:$8 sps:$4 sm:$0xff]  }
 0x221   :  { %3193 = vmatpush1.bf16.msra.mxu0 %v5423_v27  ;;  %v5484_v27 = vld [vmem:[#allocation5 + $0xa94] ss:$8 sps:$4 sm:$0xff]  }
 0x222   :  { %3194 = vmatprep.subr.bf16.mxu0 %v5428_v28  ;;  %v5581_v28 = vld [vmem:[#allocation8 + $0x80] ss:$8 sps:$4 sm:$0xff]  }
 0x223   :  { %3528 = vmatpush1.bf16.msra.mxu1 %v5581_v28  ;;  %v5552_v28 = vld [vmem:[#allocation5 + $0xbf0] ss:$8 sps:$4 sm:$0xff]  }
 0x225   :  { %3195 = vmatpush1.bf16.msra.mxu0 %v5426_v21  ;;  %v5482_v21 = vld [vmem:[#allocation5 + $0xa90] ss:$8 sps:$4 sm:$0xff]  }
 0x226   :  { %3196 = vmatprep.subr.bf16.mxu0 %v5431_v30  ;;  %v5586_v30 = vld [vmem:[#allocation8 + $0x94] ss:$8 sps:$4 sm:$0xff]  }
 0x227   :  { %3529 = vmatprep.subr.bf16.mxu1 %v5586_v30  ;;  %v5601_v30 = vld [vmem:[#allocation8 + $0xe4] ss:$8 sps:$4 sm:$0xff]  }
 0x229   :  { %3197 = vmatpush1.bf16.msra.mxu0 %v5429_v32  ;;  %v5487_v32 = vld [vmem:[#allocation5 + $0xaa4] ss:$8 sps:$4 sm:$0xff]  }
 0x22a   :  { %3198 = vmatprep.subr.bf16.mxu0 %v5434_v34  ;;  %v5584_v34 = vld [vmem:[#allocation8 + $0x90] ss:$8 sps:$4 sm:$0xff]  }
 0x22b   :  { %3530 = vmatpush1.bf16.msra.mxu1 %v5584_v34  ;;  %v5604_v34 = vld [vmem:[#allocation8 + $0xf4] ss:$8 sps:$4 sm:$0xff]  }
 0x22d   :  { %3199 = vmatpush1.bf16.msra.mxu0 %v5432_v29  ;;  %v5485_v29 = vld [vmem:[#allocation5 + $0xaa0] ss:$8 sps:$4 sm:$0xff]  }
 0x22e   :  { %3200 = vmatprep.subr.bf16.mxu0 %v5437_v35  ;;  %v5589_v35 = vld [vmem:[#allocation8 + $0xa4] ss:$8 sps:$4 sm:$0xff]  }
 0x22f   :  { %3531 = vmatprep.subr.bf16.mxu1 %v5589_v35  ;;  %v5607_v35 = vld [vmem:[#allocation11 + $0x4] ss:$8 sps:$4 sm:$0xff]  }
 0x231   :  { %3201 = vmatpush1.bf16.msra.mxu0 %v5435_v36  ;;  %v5490_v36 = vld [vmem:[#allocation5 + $0xab4] ss:$8 sps:$4 sm:$0xff]  }
 0x232   :  { %3202 = vmatprep.subr.bf16.mxu0 %v5440_v37  ;;  %v5587_v37 = vld [vmem:[#allocation8 + $0xa0] ss:$8 sps:$4 sm:$0xff]  }
 0x233   :  { %3532 = vmatpush1.bf16.msra.mxu1 %v5587_v37  ;;  %v879_v37 = vld [vmem:[#allocation7] sm:$0x3] }
 0x235   :  { %3203 = vmatpush1.bf16.msra.mxu0 %v5438_v38  ;;  %v5488_v38 = vld [vmem:[#allocation5 + $0xab0] ss:$8 sps:$4 sm:$0xff]  }
 0x236   :  { %3204 = vmatprep.subr.bf16.mxu0 %v5443_v40  ;;  %v5592_v40 = vld [vmem:[#allocation8 + $0xb4] ss:$8 sps:$4 sm:$0xff]  }
 0x237   :  { %3533 = vmatprep.subr.bf16.mxu1 %v5592_v40 }
 0x239   :  { %3205 = vmatpush1.bf16.msra.mxu0 %v5441_v12  ;;  %v5493_v12 = vld [vmem:[#allocation5 + $0xac4] ss:$8 sps:$4 sm:$0xff]  }
 0x23a   :  { %3206 = vmatprep.subr.bf16.mxu0 %v5446_v14  ;;  %v5590_v14 = vld [vmem:[#allocation8 + $0xb0] ss:$8 sps:$4 sm:$0xff]  }
 0x23b   :  { %3534 = vmatpush1.bf16.msra.mxu1 %v5590_v14 }
 0x23d   :  { %3207 = vmatpush1.bf16.msra.mxu0 %v5444_v41  ;;  %v5491_v41 = vld [vmem:[#allocation5 + $0xac0] ss:$8 sps:$4 sm:$0xff]  }
 0x23e   :  { %3208 = vmatprep.subr.bf16.mxu0 %v5449_v42  ;;  %v5595_v42 = vld [vmem:[#allocation8 + $0xc4] ss:$8 sps:$4 sm:$0xff]  }
 0x23f   :  { %3535 = vmatprep.subr.bf16.mxu1 %v5595_v42 }
 0x241   :  { %3209 = vmatpush1.bf16.msra.mxu0 %v5447_v43  ;;  %v5496_v43 = vld [vmem:[#allocation5 + $0xad4] ss:$8 sps:$4 sm:$0xff]  }
 0x242   :  { %3210 = vmatprep.subr.bf16.mxu0 %v5452_v44  ;;  %v5593_v44 = vld [vmem:[#allocation8 + $0xc0] ss:$8 sps:$4 sm:$0xff]  }
 0x243   :  { %3536 = vmatpush1.bf16.msra.mxu1 %v5593_v44 }
 0x244   :  { %3537 = vmatprep.subr.bf16.mxu1 %v5598_v46 }
 0x245   :  { %3211 = vmatpush1.bf16.msra.mxu0 %v5450_v47  ;;  %v5499_v47 = vld [vmem:[#allocation5 + $0xae4] ss:$8 sps:$4 sm:$0xff]  }
 0x246   :  { %3221 = vmatprep.subr.bf16.mxu0 %v5457_v50  ;;  %v5497_v50 = vld [vmem:[#allocation5 + $0xae0] ss:$8 sps:$4 sm:$0xff]  }
 0x247   :  { %3538 = vmatpush1.bf16.msra.mxu1 %v5596_v48 }
 0x248   :  { %3213 = vmatmul.mubr.bf16.vlgmr.msra.gmra.mrb[0].mxu0 %v489_v51  ;;  %v5502_v51 = vld [vmem:[#allocation5 + $0xaf4] ss:$8 sps:$4 sm:$0xff]   ;;  %3539 = vmatprep.subr.bf16.mxu1 %v5601_v30 }
 0x249   :  { %3222 = vmatpush1.bf16.msra.mxu0 %v5455_v53  ;;  %3253 = vmatprep.mubr.bf16.mxu0 %v492_v54  ;;  %v5500_v53 = vld [vmem:[#allocation5 + $0xaf0] ss:$8 sps:$4 sm:$0xff]   ;;  %v446_v54 = vcombine.high %v6338_v49, %v6341_v39  ;;  %v5518_v49 = vld [vmem:[#allocation5 + $0xb34] ss:$8 sps:$4 sm:$0xff]  }
 0x24a   :  { %3223 = vmatprep.subr.bf16.mxu0 %v5460_v18  ;;  %v5509_v18 = vld [vmem:[#allocation5 + $0xb04] ss:$8 sps:$4 sm:$0xff]   ;;  %v5516_v39 = vld [vmem:[#allocation5 + $0xb30] ss:$8 sps:$4 sm:$0xff]  }
 0x24b   :  { %v494_v23 = vpack.c.bf16 %v446_v54, %v446_v54  ;;  %v5610_v54 = vld [vmem:[#allocation11 + $0x14] ss:$8 sps:$4 sm:$0xff]  }
 0x24d   :  { %3224 = vmatpush1.bf16.msra.mxu0 %v5458_v56  ;;  %v5507_v56 = vld [vmem:[#allocation5 + $0xb00] ss:$8 sps:$4 sm:$0xff]  }
 0x24e   :  { %3225 = vmatprep.subr.bf16.mxu0 %v5463_v58  ;;  %v5510_v58 = vld [vmem:[#allocation5 + $0xb10] ss:$8 sps:$4 sm:$0xff]  }
 0x251   :  { %3226 = vmatpush1.bf16.msra.mxu0 %v5461_v59  ;;  %v5513_v59 = vld [vmem:[#allocation5 + $0xb20] ss:$8 sps:$4 sm:$0xff]  }
 0x252   :  { %3227 = vmatprep.subr.bf16.mxu0 %v5466_v61  ;;  %v5524_v61 = vld [vmem:[#allocation5 + $0xb54] ss:$8 sps:$4 sm:$0xff]  }
 0x255   :  { %3228 = vmatpush1.bf16.msra.mxu0 %v5464_v63  ;;  %v5527_v63 = vld [vmem:[#allocation5 + $0xb64] ss:$8 sps:$4 sm:$0xff]  }
 0x256   :  { %3229 = vmatprep.subr.bf16.mxu0 %v5469_v1  ;;  %v5530_v1 = vld [vmem:[#allocation5 + $0xb74] ss:$8 sps:$4 sm:$0xff]  }
 0x259   :  { %3230 = vmatpush1.bf16.msra.mxu0 %v5467_v31  ;;  %v5533_v31 = vld [vmem:[#allocation5 + $0xb84] ss:$8 sps:$4 sm:$0xff]  }
 0x25a   :  { %3231 = vmatprep.subr.bf16.mxu0 %v5472_v4  ;;  %v5536_v4 = vld [vmem:[#allocation5 + $0xb94] ss:$8 sps:$4 sm:$0xff]  }
 0x25d   :  { %3232 = vmatpush1.bf16.msra.mxu0 %v5470_v6  ;;  %v5539_v6 = vld [vmem:[#allocation5 + $0xba4] ss:$8 sps:$4 sm:$0xff]  }
 0x25e   :  { %3233 = vmatprep.subr.bf16.mxu0 %v5475_v8  ;;  %v5542_v8 = vld [vmem:[#allocation5 + $0xbb4] ss:$8 sps:$4 sm:$0xff]  }
 0x261   :  { %3234 = vmatpush1.bf16.msra.mxu0 %v5473_v33 }
 0x262   :  { %3235 = vmatprep.subr.bf16.mxu0 %v5478_v13 }
 0x265   :  { %3236 = vmatpush1.bf16.msra.mxu0 %v5476_v26 }
 0x266   :  { %3237 = vmatprep.subr.bf16.mxu0 %v5481_v19  ;;  %v5548_v19 = vld [vmem:[#allocation5 + $0xbd4] ss:$8 sps:$4 sm:$0xff]  }
 0x269   :  { %3238 = vmatpush1.bf16.msra.mxu0 %v5479_v24  ;;  %v5551_v24 = vld [vmem:[#allocation5 + $0xbe4] ss:$8 sps:$4 sm:$0xff]  }
 0x26a   :  { %3239 = vmatprep.subr.bf16.mxu0 %v5484_v27  ;;  %v5554_v27 = vld [vmem:[#allocation5 + $0xbf4] ss:$8 sps:$4 sm:$0xff]  }
 0x26d   :  { %3240 = vmatpush1.bf16.msra.mxu0 %v5482_v21  ;;  %v493_v21 = vpack.c.bf16 %v6347_v52, %v6347_v52 }
 0x26e   :  { %3241 = vmatprep.subr.bf16.mxu0 %v5487_v32  ;;  %v5599_v32 = vld [vmem:[#allocation8 + $0xe0] ss:$8 sps:$4 sm:$0xff]  }
 0x26f   :  { %3540 = vmatpush1.bf16.msra.mxu1 %v5599_v32 }
 0x270   :  { %3541 = vmatprep.subr.bf16.mxu1 %v5604_v34  ;;  %v5653_v34 = vld [vmem:[#allocation14] ss:$8 sps:$4 sm:$0xff]  }
 0x271   :  { %3242 = vmatpush1.bf16.msra.mxu0 %v5485_v29  ;;  %v5602_v29 = vld [vmem:[#allocation8 + $0xf0] ss:$8 sps:$4 sm:$0xff]  }
 0x272   :  { %3243 = vmatprep.subr.bf16.mxu0 %v5490_v36  ;;  %v6356_v36 = vsub.s32 0, %v6234_v17 }
 0x273   :  { %3542 = vmatpush1.bf16.msra.mxu1 %v5602_v29 }
 0x274   :  { %3760 = vmatprep.subr.bf16.mxu1 %v5607_v35  ;;  %v884_v52 = vrot.slane %v879_v37, %v6356_v36  ;;  %v5658_v35 = vld [vmem:[#allocation14 + $0x14] ss:$8 sps:$4 sm:$0xff]  }
 0x275   :  { %3244 = vmatpush1.bf16.msra.mxu0 %v5488_v38  ;;  %v6359_v38 = vsub.s32 1, %v6234_v17  ;;  %v5608_v17 = vld [vmem:[#allocation11 + $0x10] ss:$8 sps:$4 sm:$0xff]  }
 0x276   :  { %3245 = vmatprep.subr.bf16.mxu0 %v5493_v12 }
 0x277   :  { %v888_v40 = vrot.slane %v879_v37, %v6359_v38  ;;  %v5656_v37 = vld [vmem:[#allocation14 + $0x10] ss:$8 sps:$4 sm:$0xff]  }
 0x279   :  { %3246 = vmatpush1.bf16.msra.mxu0 %v5491_v41 }
 0x27a   :  { %3247 = vmatprep.subr.bf16.mxu0 %v5496_v43 }
 0x27d   :  { %3248 = vmatpush1.bf16.msra.mxu0 %v5494_v45 }
 0x27e   :  { %3249 = vmatprep.subr.bf16.mxu0 %v5499_v47 }
 0x281   :  { %3250 = vmatpush1.bf16.msra.mxu0 %v5497_v50 }
 0x282   :  { %3251 = vmatprep.subr.bf16.mxu0 %v5502_v51  ;;  %v5605_v51 = vld [vmem:[#allocation11] ss:$8 sps:$4 sm:$0xff]  }
 0x285   :  { %3252 = vmatpush1.bf16.msra.mxu0 %v5500_v53 }
 0x286   :  { %3262 = vmatprep.subr.bf16.mxu0 %v5509_v18  ;;  %v5613_v18 = vld [vmem:[#allocation11 + $0x24] ss:$8 sps:$4 sm:$0xff]  }
 0x288   :  { %3254 = vmatmul.mubr.bf16.vlgmr.msra.gmra.mrb[0].mxu0 %v491_v55  ;;  %v5611_v55 = vld [vmem:[#allocation11 + $0x20] ss:$8 sps:$4 sm:$0xff]  }
 0x289   :  { %3263 = vmatpush1.bf16.msra.mxu0 %v5507_v56  ;;  %3294 = vmatprep.mubr.bf16.mxu0 %v494_v23  ;;  %v5616_v56 = vld [vmem:[#allocation11 + $0x34] ss:$8 sps:$4 sm:$0xff]   ;;  %v5614_v23 = vld [vmem:[#allocation11 + $0x30] ss:$8 sps:$4 sm:$0xff]  }
 0x28a   :  { %3264 = vmatprep.subr.bf16.mxu0 %v5512_v57  ;;  %v5619_v57 = vld [vmem:[#allocation11 + $0x44] ss:$8 sps:$4 sm:$0xff]  }
 0x28d   :  { %3265 = vmatpush1.bf16.msra.mxu0 %v5510_v58  ;;  %v5617_v58 = vld [vmem:[#allocation11 + $0x40] ss:$8 sps:$4 sm:$0xff]  }
 0x28e   :  { %3266 = vmatprep.subr.bf16.mxu0 %v5515_v20  ;;  %v5622_v20 = vld [vmem:[#allocation11 + $0x54] ss:$8 sps:$4 sm:$0xff]  }
 0x291   :  { %3267 = vmatpush1.bf16.msra.mxu0 %v5513_v59  ;;  %v5620_v59 = vld [vmem:[#allocation11 + $0x50] ss:$8 sps:$4 sm:$0xff]  }
 0x292   :  { %3268 = vmatprep.subr.bf16.mxu0 %v5518_v49  ;;  %v5625_v49 = vld [vmem:[#allocation11 + $0x64] ss:$8 sps:$4 sm:$0xff]  }
 0x295   :  { %3269 = vmatpush1.bf16.msra.mxu0 %v5516_v39  ;;  %v5623_v39 = vld [vmem:[#allocation11 + $0x60] ss:$8 sps:$4 sm:$0xff]  }
 0x296   :  { %3270 = vmatprep.subr.bf16.mxu0 %v5521_v60  ;;  %v5628_v60 = vld [vmem:[#allocation11 + $0x74] ss:$8 sps:$4 sm:$0xff]  }
 0x299   :  { %3271 = vmatpush1.bf16.msra.mxu0 %v5519_v9  ;;  %v5626_v9 = vld [vmem:[#allocation11 + $0x70] ss:$8 sps:$4 sm:$0xff]  }
 0x29a   :  { %3272 = vmatprep.subr.bf16.mxu0 %v5524_v61  ;;  %v5631_v61 = vld [vmem:[#allocation11 + $0x84] ss:$8 sps:$4 sm:$0xff]  }
 0x29d   :  { %3273 = vmatpush1.bf16.msra.mxu0 %v5522_v62  ;;  %v5629_v62 = vld [vmem:[#allocation11 + $0x80] ss:$8 sps:$4 sm:$0xff]  }
 0x29e   :  { %3274 = vmatprep.subr.bf16.mxu0 %v5527_v63  ;;  %v5634_v63 = vld [vmem:[#allocation11 + $0x94] ss:$8 sps:$4 sm:$0xff]  }
 0x2a0   :  { %v2968_v33 = vpop.f32.mrb[0].mxu1 }
 0x2a1   :  { %3275 = vmatpush1.bf16.msra.mxu0 %v5525_v0  ;;  %v2970_v13 = vpop.f32.mrb[1].mxu1  ;;  %v4880_v12 = vadd.f32 %v2968_v33, %v884_v52  ;;  %v5632_v0 = vld [vmem:[#allocation11 + $0x90] ss:$8 sps:$4 sm:$0xff]   ;;  %v5652_v33 = vld [vmem:[#allocation11 + $0xf4] ss:$8 sps:$4 sm:$0xff]  }
 0x2a2   :  { %3276 = vmatprep.subr.bf16.mxu0 %v5530_v1  ;;  %v2972_v15 = vpop.f32.mrb[2].mxu1  ;;  %v4882_v14 = vadd.f32 %v2970_v13, %v888_v40  ;;  %v5637_v1 = vld [vmem:[#allocation11 + $0xa4] ss:$8 sps:$4 sm:$0xff]  }
 0x2a3   :  { %v2973_v26 = vpop.f32.mrb[3].mxu1  ;;  %v5655_v13 = vld [vmem:[#allocation14 + $0x4] ss:$8 sps:$4 sm:$0xff]   ;;  %v3339_v15 = vld [vmem:[#allocation10] sm:$0x3] }
 0x2a4   :  { %v3344_v26 = vrot.slane %v3339_v15, %v6356_v36  ;;  %v5661_v52 = vld [vmem:[#allocation14 + $0x24] ss:$8 sps:$4 sm:$0xff]   ;;  %v5659_v40 = vld [vmem:[#allocation14 + $0x20] ss:$8 sps:$4 sm:$0xff]  }
 0x2a5   :  { %3277 = vmatpush1.bf16.msra.mxu0 %v5528_v2  ;;  %v5635_v2 = vld [vmem:[#allocation11 + $0xa0] ss:$8 sps:$4 sm:$0xff]  }
 0x2a6   :  { %3278 = vmatprep.subr.bf16.mxu0 %v5533_v31  ;;  %v5640_v31 = vld [vmem:[#allocation11 + $0xb4] ss:$8 sps:$4 sm:$0xff]  }
 0x2a9   :  { %3279 = vmatpush1.bf16.msra.mxu0 %v5531_v3  ;;  %v5638_v3 = vld [vmem:[#allocation11 + $0xb0] ss:$8 sps:$4 sm:$0xff]  }
 0x2aa   :  { %3280 = vmatprep.subr.bf16.mxu0 %v5536_v4  ;;  %v5643_v4 = vld [vmem:[#allocation11 + $0xc4] ss:$8 sps:$4 sm:$0xff]  }
 0x2ad   :  { %3281 = vmatpush1.bf16.msra.mxu0 %v5534_v5  ;;  %v5641_v5 = vld [vmem:[#allocation11 + $0xc0] ss:$8 sps:$4 sm:$0xff]  }
 0x2ae   :  { %3282 = vmatprep.subr.bf16.mxu0 %v5539_v6  ;;  %v5646_v6 = vld [vmem:[#allocation11 + $0xd4] ss:$8 sps:$4 sm:$0xff]  }
 0x2b1   :  { %3283 = vmatpush1.bf16.msra.mxu0 %v5537_v7  ;;  %v5644_v7 = vld [vmem:[#allocation11 + $0xd0] ss:$8 sps:$4 sm:$0xff]  }
 0x2b2   :  { %3284 = vmatprep.subr.bf16.mxu0 %v5542_v8  ;;  %v5649_v8 = vld [vmem:[#allocation11 + $0xe4] ss:$8 sps:$4 sm:$0xff]  }
 0x2b5   :  { %3285 = vmatpush1.bf16.msra.mxu0 %v5540_v10  ;;  %v5647_v10 = vld [vmem:[#allocation11 + $0xe0] ss:$8 sps:$4 sm:$0xff]  }
 0x2b6   :  { %3286 = vmatprep.subr.bf16.mxu0 %v5545_v11  ;;  %v5650_v11 = vld [vmem:[#allocation11 + $0xf0] ss:$8 sps:$4 sm:$0xff]  }
 0x2b9   :  { %3287 = vmatpush1.bf16.msra.mxu0 %v5543_v16  ;;  %v3348_v16 = vrot.slane %v3339_v15, %v6359_v38  ;;  %v5706_v15 = vld [vmem:[%s6450_s9 + $0x10] sm:$0xff]  }
 0x2ba   :  { %3288 = vmatprep.subr.bf16.mxu0 %v5548_v19 }
 0x2bd   :  { %3289 = vmatpush1.bf16.msra.mxu0 %v5546_v22 }
 0x2be   :  { %3290 = vmatprep.subr.bf16.mxu0 %v5551_v24 }
 0x2c1   :  { %3291 = vmatpush1.bf16.msra.mxu0 %v5549_v25 }
 0x2c2   :  { %3292 = vmatprep.subr.bf16.mxu0 %v5554_v27 }
 0x2c5   :  { %3293 = vmatpush1.bf16.msra.mxu0 %v5552_v28 }
 0x2c8   :  { %3295 = vmatmul.mubr.bf16.vlgmr.msra.gmra.mrb[0].mxu0 %v493_v21 }
 0x39b   :  { %v3296_v41 = vpop.f32.mrb[0].mxu0 }
 0x39c   :  { %v4881_v42 = vadd.f32 %v4880_v12, %v3296_v41  ;;  %v3298_v43 = vpop.f32.mrb[1].mxu0  ;;  %v5664_v12 = vld [vmem:[#allocation14 + $0x34] ss:$8 sps:$4 sm:$0xff]   ;;  %v5667_v41 = vld [vmem:[#allocation14 + $0x44] ss:$8 sps:$4 sm:$0xff]  }
 0x39d   :  { %v4883_v44 = vadd.f32 %v4882_v14, %v3298_v43  ;;  %v3300_v45 = vpop.f32.mrb[2].mxu0  ;;  %v5662_v14 = vld [vmem:[#allocation14 + $0x30] ss:$8 sps:$4 sm:$0xff]   ;;  %v5670_v43 = vld [vmem:[#allocation14 + $0x54] ss:$8 sps:$4 sm:$0xff]  }
 0x39e   :  { %v3303_v46 = vmax.f32 %v4881_v42, 0.0  ;;  %v3301_v47 = vpop.f32.mrb[3].mxu0  ;;  %v5665_v42 = vld [vmem:[#allocation14 + $0x40] ss:$8 sps:$4 sm:$0xff]   ;;  %v5673_v45 = vld [vmem:[#allocation14 + $0x64] ss:$8 sps:$4 sm:$0xff]  }
 0x39f   :  { %v3304_v48 = vmax.f32 %v4883_v44, 0.0  ;;  %v5668_v44 = vld [vmem:[#allocation14 + $0x50] ss:$8 sps:$4 sm:$0xff]   ;;  %v5676_v47 = vld [vmem:[#allocation14 + $0x74] ss:$8 sps:$4 sm:$0xff]  }
 0x3a0   :  { %v3305_v53 = vpack.c.bf16 %v3303_v46, %v3303_v46  ;;  %v5671_v46 = vld [vmem:[#allocation14 + $0x60] ss:$8 sps:$4 sm:$0xff]  }
 0x3a1   :  { %v3306_v50 = vpack.c.bf16 %v3304_v48, %v3304_v48  ;;  %v5674_v48 = vld [vmem:[#allocation14 + $0x70] ss:$8 sps:$4 sm:$0xff]  }
 0x3a3   :  { %3543 = vmatprep.mubr.bf16.mxu1 %v3306_v50  ;;  %v5679_v50 = vld [vmem:[#allocation14 + $0x84] ss:$8 sps:$4 sm:$0xff]  }
 0x3a4   :  { %3544 = vmatmul.mubr.bf16.vlgmr.msra.gmra.mrb[4].mxu1 %v3305_v53  ;;  %v5682_v53 = vld [vmem:[#allocation14 + $0x94] ss:$8 sps:$4 sm:$0xff]  }
 0x3a5   :  { %3761 = vmatpush1.bf16.msra.mxu1 %v5605_v51  ;;  %v5677_v51 = vld [vmem:[#allocation14 + $0x80] ss:$8 sps:$4 sm:$0xff]  }
 0x3a6   :  { %3762 = vmatprep.subr.bf16.mxu1 %v5610_v54  ;;  %v5680_v54 = vld [vmem:[#allocation14 + $0x90] ss:$8 sps:$4 sm:$0xff]  }
 0x3a9   :  { %3763 = vmatpush1.bf16.msra.mxu1 %v5608_v17  ;;  %v5685_v17 = vld [vmem:[#allocation14 + $0xa4] ss:$8 sps:$4 sm:$0xff]  }
 0x3aa   :  { %3764 = vmatprep.subr.bf16.mxu1 %v5613_v18  ;;  %v5683_v18 = vld [vmem:[#allocation14 + $0xa0] ss:$8 sps:$4 sm:$0xff]  }
 0x3ad   :  { %3765 = vmatpush1.bf16.msra.mxu1 %v5611_v55  ;;  %v5688_v55 = vld [vmem:[#allocation14 + $0xb4] ss:$8 sps:$4 sm:$0xff]  }
 0x3ae   :  { %3766 = vmatprep.subr.bf16.mxu1 %v5616_v56  ;;  %v5686_v56 = vld [vmem:[#allocation14 + $0xb0] ss:$8 sps:$4 sm:$0xff]  }
 0x3b1   :  { %3767 = vmatpush1.bf16.msra.mxu1 %v5614_v23  ;;  %v5691_v23 = vld [vmem:[#allocation14 + $0xc4] ss:$8 sps:$4 sm:$0xff]  }
 0x3b2   :  { %3768 = vmatprep.subr.bf16.mxu1 %v5619_v57  ;;  %v5689_v57 = vld [vmem:[#allocation14 + $0xc0] ss:$8 sps:$4 sm:$0xff]  }
 0x3b5   :  { %3769 = vmatpush1.bf16.msra.mxu1 %v5617_v58  ;;  %v5694_v58 = vld [vmem:[#allocation14 + $0xd4] ss:$8 sps:$4 sm:$0xff]  }
 0x3b6   :  { %3770 = vmatprep.subr.bf16.mxu1 %v5622_v20  ;;  %v5692_v20 = vld [vmem:[#allocation14 + $0xd0] ss:$8 sps:$4 sm:$0xff]  }
 0x3b9   :  { %3771 = vmatpush1.bf16.msra.mxu1 %v5620_v59  ;;  %v5697_v59 = vld [vmem:[#allocation14 + $0xe4] ss:$8 sps:$4 sm:$0xff]  }
 0x3ba   :  { %3772 = vmatprep.subr.bf16.mxu1 %v5625_v49  ;;  %v5695_v49 = vld [vmem:[#allocation14 + $0xe0] ss:$8 sps:$4 sm:$0xff]  }
 0x3bd   :  { %3773 = vmatpush1.bf16.msra.mxu1 %v5623_v39  ;;  %v5700_v39 = vld [vmem:[#allocation14 + $0xf4] ss:$8 sps:$4 sm:$0xff]  }
 0x3be   :  { %3774 = vmatprep.subr.bf16.mxu1 %v5628_v60  ;;  %v5698_v60 = vld [vmem:[#allocation14 + $0xf0] ss:$8 sps:$4 sm:$0xff]  }
 0x3c1   :  { %3775 = vmatpush1.bf16.msra.mxu1 %v5626_v9  ;;  %v5701_v9 = vld [vmem:[%s6450_s9 + $0x40] sm:$0xff]  }
 0x3c2   :  { %3776 = vmatprep.subr.bf16.mxu1 %v5631_v61  ;;  %v3588_v61 = vld [vmem:[#allocation13] sm:$0x3] }
 0x3c5   :  { %3777 = vmatpush1.bf16.msra.mxu1 %v5629_v62  ;;  %v3593_v62 = vrot.slane %v3588_v61, %v6356_v36 }
 0x3c6   :  { %3778 = vmatprep.subr.bf16.mxu1 %v5634_v63  ;;  %v3597_v63 = vrot.slane %v3588_v61, %v6359_v38 }
 0x3c9   :  { %3779 = vmatpush1.bf16.msra.mxu1 %v5632_v0 }
 0x3ca   :  { %3780 = vmatprep.subr.bf16.mxu1 %v5637_v1 }
 0x3cd   :  { %3781 = vmatpush1.bf16.msra.mxu1 %v5635_v2 }
 0x3ce   :  { %3782 = vmatprep.subr.bf16.mxu1 %v5640_v31 }
 0x3d1   :  { %3783 = vmatpush1.bf16.msra.mxu1 %v5638_v3 }
 0x3d2   :  { %3784 = vmatprep.subr.bf16.mxu1 %v5643_v4 }
 0x3d5   :  { %3785 = vmatpush1.bf16.msra.mxu1 %v5641_v5 }
 0x3d6   :  { %3786 = vmatprep.subr.bf16.mxu1 %v5646_v6 }
 0x3d9   :  { %3787 = vmatpush1.bf16.msra.mxu1 %v5644_v7 }
 0x3da   :  { %3788 = vmatprep.subr.bf16.mxu1 %v5649_v8  ;;  %v5702_v8 = vld [vmem:[%s6450_s9] sm:$0xff]  }
 0x3dd   :  { %3789 = vmatpush1.bf16.msra.mxu1 %v5647_v10 }
 0x3de   :  { %3790 = vmatprep.subr.bf16.mxu1 %v5652_v33  ;;  %v5703_v33 = vld [vmem:[%s6450_s9 + $0x48] sm:$0xff]  }
 0x3e1   :  { %3791 = vmatpush1.bf16.msra.mxu1 %v5650_v11  ;;  %v5704_v11 = vld [vmem:[%s6450_s9 + $0x8] sm:$0xff]  }
 0x3e2   :  { %4009 = vmatprep.subr.bf16.mxu1 %v5655_v13  ;;  %v5705_v13 = vld [vmem:[%s6450_s9 + $0x50] sm:$0xff]  }
 0x477   :  { %v3545_v19 = vpop.f32.mrb[4].mxu1 }
 0x478   :  { %v3546_v22 = vadd.f32 %v3545_v19, %v3344_v26  ;;  %v3547_v24 = vpop.f32.mrb[5].mxu1  ;;  %v5707_v26 = vld [vmem:[%s6450_s9 + $0x58] sm:$0xff]   ;;  %v5709_v19 = vld [vmem:[%s6450_s9 + $0x60] sm:$0xff]  }
 0x479   :  { %v3548_v25 = vadd.f32 %v3547_v24, %v3348_v16  ;;  %v3549_v27 = vpop.f32.mrb[6].mxu1  ;;  %v5708_v16 = vld [vmem:[%s6450_s9 + $0x18] sm:$0xff]   ;;  %v5711_v24 = vld [vmem:[%s6450_s9 + $0x68] sm:$0xff]  }
 0x47a   :  { %v3552_v28 = vmax.f32 %v3546_v22, 0.0  ;;  %v3550_v21 = vpop.f32.mrb[7].mxu1  ;;  %v5710_v22 = vld [vmem:[%s6450_s9 + $0x20] sm:$0xff]   ;;  %v5713_v27 = vld [vmem:[%s6450_s9 + $0x70] sm:$0xff]  }
 0x47b   :  { %v3553_v30 = vmax.f32 %v3548_v25, 0.0  ;;  %v5712_v25 = vld [vmem:[%s6450_s9 + $0x28] sm:$0xff]   ;;  %v5715_v21 = vld [vmem:[%s6450_s9 + $0x78] sm:$0xff]  }
 0x47c   :  { %v3554_v29 = vpack.c.bf16 %v3552_v28, %v3552_v28  ;;  %v5714_v28 = vld [vmem:[%s6450_s9 + $0x30] sm:$0xff]  }
 0x47d   :  { %v3555_v32 = vpack.c.bf16 %v3553_v30, %v3553_v30  ;;  %v5716_v30 = vld [vmem:[%s6450_s9 + $0x38] sm:$0xff]  }
 0x47f   :  { %3792 = vmatprep.mubr.bf16.mxu1 %v3555_v32  ;;  %v6015_v32 = vmov 0.0  }
 0x480   :  { %3793 = vmatmul.mubr.bf16.vlgmr.msra.gmra.mrb[8].mxu1 %v3554_v29 }
 0x481   :  { %4010 = vmatpush1.bf16.msra.mxu1 %v5653_v34  ;;  %v3837_v34 = vld [vmem:[#allocation16] sm:$0x3] }
 0x482   :  { %4011 = vmatprep.subr.bf16.mxu1 %v5658_v35  ;;  %v3842_v29 = vrot.slane %v3837_v34, %v6356_v36  ;;  %v3846_v35 = vrot.slane %v3837_v34, %v6359_v38  ;;  %v5718_v36 = vld [vmem:[%s6452_s11 + $0x8] sm:$0xff]   ;;  %v5719_v38 = vld [vmem:[%s6452_s11 + $0x10] sm:$0xff]  }
 0x485   :  { %4012 = vmatpush1.bf16.msra.mxu1 %v5656_v37 }
 0x486   :  { %4013 = vmatprep.subr.bf16.mxu1 %v5661_v52 }
 0x489   :  { %4014 = vmatpush1.bf16.msra.mxu1 %v5659_v40 }
 0x48a   :  { %4015 = vmatprep.subr.bf16.mxu1 %v5664_v12 }
 0x48d   :  { %4016 = vmatpush1.bf16.msra.mxu1 %v5662_v14 }
 0x48e   :  { %4017 = vmatprep.subr.bf16.mxu1 %v5667_v41 }
 0x491   :  { %4018 = vmatpush1.bf16.msra.mxu1 %v5665_v42 }
 0x492   :  { %4019 = vmatprep.subr.bf16.mxu1 %v5670_v43 }
 0x495   :  { %4020 = vmatpush1.bf16.msra.mxu1 %v5668_v44 }
 0x496   :  { %4021 = vmatprep.subr.bf16.mxu1 %v5673_v45  ;;  %v5717_v45 = vld [vmem:[%s6452_s11] sm:$0xff]  }
 0x499   :  { %4022 = vmatpush1.bf16.msra.mxu1 %v5671_v46 }
 0x49a   :  { %4023 = vmatprep.subr.bf16.mxu1 %v5676_v47  ;;  %v5720_v47 = vld [vmem:[%s6452_s11 + $0x18] sm:$0xff]  }
 0x49d   :  { %4024 = vmatpush1.bf16.msra.mxu1 %v5674_v48 }
 0x49e   :  { %4025 = vmatprep.subr.bf16.mxu1 %v5679_v50  ;;  %v4818_v50 = vld [vmem:[#allocation17] ss:$0 sm:$0xff] }
 0x4a1   :  { %4026 = vmatpush1.bf16.msra.mxu1 %v5677_v51 }
 0x4a2   :  { %4027 = vmatprep.subr.bf16.mxu1 %v5682_v53 }
 0x4a5   :  { %4028 = vmatpush1.bf16.msra.mxu1 %v5680_v54 }
 0x4a6   :  { %4029 = vmatprep.subr.bf16.mxu1 %v5685_v17 }
 0x4a9   :  { %4030 = vmatpush1.bf16.msra.mxu1 %v5683_v18 }
 0x4aa   :  { %4031 = vmatprep.subr.bf16.mxu1 %v5688_v55 }
 0x4ad   :  { %4032 = vmatpush1.bf16.msra.mxu1 %v5686_v56 }
 0x4ae   :  { %4033 = vmatprep.subr.bf16.mxu1 %v5691_v23  ;;  %v4835_v23 = vld [vmem:[#allocation19] ss:$0 sm:$0xff] }
 0x4b1   :  { %4034 = vmatpush1.bf16.msra.mxu1 %v5689_v57 }
 0x4b2   :  { %4035 = vmatprep.subr.bf16.mxu1 %v5694_v58 }
 0x4b5   :  { %4036 = vmatpush1.bf16.msra.mxu1 %v5692_v20 }
 0x4b6   :  { %4037 = vmatprep.subr.bf16.mxu1 %v5697_v59 }
 0x4b9   :  { %4038 = vmatpush1.bf16.msra.mxu1 %v5695_v49 }
 0x4ba   :  { %4039 = vmatprep.subr.bf16.mxu1 %v5700_v39 }
 0x4bd   :  { %4040 = vmatpush1.bf16.msra.mxu1 %v5698_v60 }
 0x4be   :  { %4841 = vmatprep.subr.bf16.mxu1 %v5701_v9 }
 0x553   :  { %v3794_v0 = vpop.f32.mrb[8].mxu1 }
 0x554   :  { %v3795_v1 = vadd.f32 %v3794_v0, %v3593_v62  ;;  %v3796_v2 = vpop.f32.mrb[9].mxu1 }
 0x555   :  { %v3797_v31 = vadd.f32 %v3796_v2, %v3597_v63  ;;  %v3798_v3 = vpop.f32.mrb[10].mxu1 }
 0x556   :  { %v3801_v4 = vmax.f32 %v3795_v1, 0.0  ;;  %v3799_v5 = vpop.f32.mrb[11].mxu1 }
 0x557   :  { %v3802_v6 = vmax.f32 %v3797_v31, 0.0 }
 0x558   :  { %v3803_v10 = vpack.c.bf16 %v3801_v4, %v3801_v4 }
 0x559   :  { %v3804_v7 = vpack.c.bf16 %v3802_v6, %v3802_v6 }
 0x55b   :  { %4041 = vmatprep.mubr.bf16.mxu1 %v3804_v7 }
 0x55c   :  { %4042 = vmatmul.mubr.bf16.vlgmr.msra.gmra.mrb[12].mxu1 %v3803_v10 }
 0x55d   :  { %4842 = vmatpush3.bf16.msra.mxu1 %v5702_v8 }
 0x55e   :  { %4843 = vmatprep.subr.bf16.mxu1 %v5703_v33 }
 0x561   :  { %4844 = vmatpush3.bf16.msra.mxu1 %v5704_v11 }
 0x562   :  { %4845 = vmatprep.subr.bf16.mxu1 %v5705_v13 }
 0x565   :  { %4846 = vmatpush3.bf16.msra.mxu1 %v5706_v15 }
 0x566   :  { %4847 = vmatprep.subr.bf16.mxu1 %v5707_v26 }
 0x569   :  { %4848 = vmatpush3.bf16.msra.mxu1 %v5708_v16 }
 0x56a   :  { %4849 = vmatprep.subr.bf16.mxu1 %v5709_v19 }
 0x56d   :  { %4850 = vmatpush3.bf16.msra.mxu1 %v5710_v22 }
 0x56e   :  { %4851 = vmatprep.subr.bf16.mxu1 %v5711_v24 }
 0x571   :  { %4852 = vmatpush3.bf16.msra.mxu1 %v5712_v25 }
 0x572   :  { %4853 = vmatprep.subr.bf16.mxu1 %v5713_v27 }
 0x575   :  { %4854 = vmatpush3.bf16.msra.mxu1 %v5714_v28 }
 0x576   :  { %4855 = vmatprep.subr.bf16.mxu1 %v5715_v21 }
 0x579   :  { %4856 = vmatpush3.bf16.msra.mxu1 %v5716_v30 }
 0x57a   :  { %4868 = vmatprep.subr.bf16.mxu1 %v6015_v32 }
 0x62f   :  { %v4043_v37 = vpop.f32.mrb[12].mxu1 }
 0x630   :  { %v4044_v52 = vadd.f32 %v4043_v37, %v3842_v29  ;;  %v4045_v40 = vpop.f32.mrb[13].mxu1 }
 0x631   :  { %v4046_v12 = vadd.f32 %v4045_v40, %v3846_v35  ;;  %v4047_v14 = vpop.f32.mrb[14].mxu1 }
 0x632   :  { %v4050_v41 = vmax.f32 %v4044_v52, 0.0  ;;  %v4048_v42 = vpop.f32.mrb[15].mxu1 }
 0x633   :  { %v4051_v43 = vmax.f32 %v4046_v12, 0.0 }
 0x634   :  { %v4052_v46 = vpack.c.bf16 %v4050_v41, %v4050_v41 }
 0x635   :  { %v4053_v44 = vpack.c.bf16 %v4051_v43, %v4051_v43 }
 0x637   :  { %4221 = vmatprep.mubr.bf16.mxu1 %v4053_v44 }
 0x638   :  { %4222 = vmatmul.mubr.bf16.vlgmr.msra.gmra.mrb[16].mxu1 %v4052_v46 }
 0x639   :  { %4869 = vmatpush3.bf16.msra.mxu1 %v5717_v45  ;;  %4876 = vmatprep.mubr.msk.bf16.mxu1 %vm6016_vm0, %v6015_v32 }
 0x63a   :  { %4870 = vmatprep.subr.bf16.mxu1 %v6015_v32 }
 0x63d   :  { %4871 = vmatpush3.bf16.msra.mxu1 %v5718_v36 }
 0x63e   :  { %4872 = vmatprep.subr.bf16.mxu1 %v6015_v32 }
 0x641   :  { %4873 = vmatpush3.bf16.msra.mxu1 %v5719_v38 }
 0x642   :  { %4874 = vmatprep.subr.bf16.mxu1 %v6015_v32 }
 0x645   :  { %4875 = vmatpush3.bf16.msra.mxu1 %v5720_v47 }
 0x70b   :  { %v4857_v48 = vpop.f32.mrb[16].mxu1 }
 0x70c   :  { %v4858_v51 = vpop.f32.mrb[17].mxu1 }
 0x70d   :  { %v4859_v53 = vadd.f32 %v4858_v51, %v4857_v48  ;;  %v4860_v54 = vpop.f32.mrb[18].mxu1 }
 0x70e   :  { %v4861_v17 = vpop.f32.mrb[19].mxu1 }
 0x70f   :  { %v4224_v18 = vadd.f32 %v4859_v53, %v4818_v50 }
 0x711   :  { %v4229_v55 = vmax.f32 %v4224_v18, 0.0 }
 0x713   :  { %v4230_v56 = vpack.c.bf16 %v4229_v55, %v4229_v55 }
 0x715   :  { %4877 = vmatmul.mubr.msk.bf16.vlgmr.msra.gmra.mrb[20].mxu1 %vm4270_vm1, %v4230_v56 }
 0x7e8   :  { %v4308_v57 = vpop.f32.mrb[20].mxu1 }
 0x7e9   :  { %v4309_v58 = vadd.f32 %v4835_v23, %v4308_v57  ;;  %v4878_v20 = vpop.f32.mrb[21].mxu1 }
 0x7ea   :  { %v4311_v59 = vpop.f32.mrb[22].mxu1 }
 0x7eb   :  { %4315 = vst.msk [vmem:[#allocation20] sm:$0xff] %vm4314_vm2, %v4309_v58  ;;  %v4879_v49 = vpop.f32.mrb[23].mxu1 }
 0x7ec   :  { %4320 = vsyncadd [#allocation4], 96  ;;  %s6017_s11 = smov [#allocation20]  }
 0x7ed   :  { %s4321_s1 = sshll.u32 %s6017_s11, 4  ;;  %s4322_s1 = int_to_ptr.vmem [resolvable:$true] %s4321_s1 }
 0x7ee   :  { %s5963_s30 = scalar_lea.vmem %s4322_s1, 32  ;;  %s5967_s6 = scalar_lea.vmem %s4322_s1, 128 }
 0x7ef   :  { %p5964_p4 = scmp.ne.s32.totalorder %s4322_s1, %s5963_s30  ;;  %p5968_p5 = scmp.lt.s32.totalorder %s4322_s1, %s4322_s1 }
 0x7f0   :  { %p5969_p6 = scmp.lt.s32.totalorder %s5967_s6, %s5963_s30 }
 0x7f2   :  { %p5970_p7 = por %p5969_p6, %p5968_p5 }
 0x7f4   :  { %p5971_p8 = pnand %p5970_p7, %p5964_p4 }
 0x7f6   :  { %5974 = shalt.err (!%p5971_p8)
}
 0x7f7   :  { %s5975_s23 = scalar_lea.hbm %s6454_s13, 32 }
 0x7f8   :  { %p5976_p9 = scmp.ne.s32.totalorder %s6454_s13, %s5975_s23  ;;  %p5979_p10 = scmp.lt.u32.totalorder %s5975_s23, %s6454_s13 }
 0x7fa   :  { %p5981_p11 = pnand %p5979_p10, %p5976_p9 }
 0x7fc   :  { %5984 = shalt.err (!%p5981_p11)
}
 0x7fd   :  { %s6018_s18 = smov 32   ;;  %s6019_s19 = smov 2  }
 0x7fe   :  { %4327 = dma.vmem_to_hbm [thread:$0]  %s4322_s1, 32, %s6454_s13, [#allocation4], %s6018_s18, %s6018_s18, %s6019_s19  }
 0x7ff   :  { %5997 = dma.done.wait [#allocation4], 128  }
 0x800   :  { %5998 = vsyncadd [#allocation4], 4294967168 }
 0x801   :  { %4331 = vsyncpa [#allocation3], 1 }
 0x802   :  { %4332 = vsyncpa [#allocation6], 1 }
 0x803   :  { %4333 = vsyncpa [#allocation9], 1 }
 0x804   :  { %4334 = vsyncpa [#allocation12], 1 }
 0x805   :  { %4335 = vsyncpa [#allocation15], 1 }
 0x806   :  { %4336 = vsyncpa [#allocation18], 1 }
 0x807   :  { %4337 = vsyncpa [#allocation4], 1 }

</bundles_post_ra>
